<compile_context>
chip_gen: v5e
topology: v5e:2x2
jax: 0.10.0
libtpu: 0.0.40
codegen_flags: <defaults>
</compile_context>

<pallas_src>
import jax
import jax.numpy as jnp
from jax.experimental import pallas as pl
from jax.experimental.pallas import tpu as pltpu


# ----------------------------------------------------------------------------
# Fused kernel: conv1x1+bias+ReLU -> conv3x3+bias+ReLU -> conv1x1 (one image).
# BN scales are already folded into w1 / w3; bias_ref packs (b1, b2).
# ----------------------------------------------------------------------------
def _proj_fused_kernel(x_ref, w1_ref, bias_ref, w3_ref, w5_ref,
                       o_ref, y1pad_ref):
    H, W, Cin = x_ref.shape
    Cmid = w1_ref.shape[1]
    Ct = w5_ref.shape[1]

    # ---- conv1x1 (BN scale folded) + bias + ReLU  (pointwise => one dot) ----
    x2d = x_ref[...].reshape(H * W, Cin)                          # bf16
    y1 = jnp.dot(x2d, w1_ref[...], preferred_element_type=jnp.float32)
    y1 = jnp.maximum(y1 + bias_ref[0:1, :], 0.0)                  # f32 epilogue

    # Stash into the zero-padded halo buffer (stays in VMEM, bf16 for MXU).
    # Whole-buffer zero is a single dense vst and keeps the border correct on
    # every grid step / core (scratch is per-core, so no cross-step reuse).
    y1pad_ref[...] = jnp.zeros_like(y1pad_ref)
    y1pad_ref[1:H + 1, 1:W + 1, :] = (
        y1.astype(y1pad_ref.dtype).reshape(H, W, Cmid))

    # ---- conv3x3 (pad=1, BN scale folded): 9 shifted accumulating dots ------
    acc = jnp.zeros((H * W, Cmid), jnp.float32)
    for dy in range(3):
        for dx in range(3):
            patch = y1pad_ref[dy:dy + H, dx:dx + W, :].reshape(H * W, Cmid)
            acc = acc + jnp.dot(patch, w3_ref[dy * 3 + dx],
                                preferred_element_type=jnp.float32)
    y2 = jnp.maximum(acc + bias_ref[1:2, :], 0.0)                 # f32 epilogue

    # ---- final conv1x1 (no BN / no ReLU / no affine) -------------------------
    out = jnp.dot(y2.astype(w5_ref.dtype), w5_ref[...],
                  preferred_element_type=jnp.float32)
    o_ref[...] = out.astype(o_ref.dtype).reshape(H, W, Ct)


# ----------------------------------------------------------------------------
# BN (eval mode) folding helper.
# ----------------------------------------------------------------------------
def fold_bn(gamma, beta, mean, var, eps=1e-5):
    scale = gamma / jnp.sqrt(var + eps)
    bias = beta - mean * scale
    return (scale.reshape(1, -1).astype(jnp.float32),
            bias.reshape(1, -1).astype(jnp.float32))


# ----------------------------------------------------------------------------
# Proj forward (single fused Pallas call).
# ----------------------------------------------------------------------------
def proj_forward(x_nchw, params):
    N, Cin, H, W = x_nchw.shape
    Cmid = params["w1"].shape[-1]
    Ct = params["w5"].shape[-1]

    # NCHW -> NHWC, bf16 at the kernel boundary (f32 accumulation inside).
    x = jnp.transpose(x_nchw, (0, 2, 3, 1)).astype(jnp.bfloat16)

    s1, b1 = fold_bn(*params["bn1"])                      # (1, Cmid) f32 each
    s2, b2 = fold_bn(*params["bn2"])

    # Fold the BN scales into the (tiny) conv weights in f32, then cast bf16.
    w1 = (params["w1"] * s1).astype(jnp.bfloat16)                 # (Cin, Cmid)
    w3 = (params["w3"] * s2.reshape(1, 1, 1, Cmid)
          ).reshape(9, Cmid, Cmid).astype(jnp.bfloat16)           # HWIO flat
    w5 = params["w5"].astype(jnp.bfloat16)                        # (Cmid, Ct)
    bias = jnp.concatenate([b1, b2], axis=0)                      # (2, Cmid) f32

    out_nhwc = pl.pallas_call(
        _proj_fused_kernel,
        out_shape=jax.ShapeDtypeStruct((N, H, W, Ct), jnp.float32),
        grid_spec=pltpu.PrefetchScalarGridSpec(
            num_scalar_prefetch=0,
            grid=(N,),
            in_specs=[
                pl.BlockSpec((None, H, W, Cin), lambda n: (n, 0, 0, 0)),
                pl.BlockSpec((Cin, Cmid), lambda n: (0, 0)),
                pl.BlockSpec((2, Cmid), lambda n: (0, 0)),
                pl.BlockSpec((9, Cmid, Cmid), lambda n: (0, 0, 0)),
                pl.BlockSpec((Cmid, Ct), lambda n: (0, 0)),
            ],
            out_specs=pl.BlockSpec((None, H, W, Ct), lambda n: (n, 0, 0, 0)),
            scratch_shapes=[
                pltpu.VMEM((H + 2, W + 2, Cmid), jnp.bfloat16),   # halo'd y1
            ],
        ),
        compiler_params=pltpu.CompilerParams(
            dimension_semantics=("parallel",),
            vmem_limit_bytes=32 * 1024 * 1024,   # safe on v5e/v6e/v7x
        ),
    )(x, w1, bias, w3, w5)

    return jnp.transpose(out_nhwc, (0, 3, 1, 2))                  # NHWC -> NCHW


# ----------------------------------------------------------------------------
# Pure-JAX reference (f32, XLA convs) for a sanity check.
# ----------------------------------------------------------------------------
def proj_reference(x_nchw, params):
    x = jnp.transpose(x_nchw, (0, 2, 3, 1))
    dn = ("NHWC", "HWIO", "NHWC")

    def conv(v, w_hwio):
        return jax.lax.conv_general_dilated(v, w_hwio, (1, 1), "SAME",
                                            dimension_numbers=dn)

    Cin = x.shape[-1]
    Cmid = params["w1"].shape[-1]

    s1, b1 = fold_bn(*params["bn1"])
    y = conv(x, params["w1"].reshape(1, 1, Cin, Cmid)) * s1 + b1
    y = jnp.maximum(y, 0.0)

    s2, b2 = fold_bn(*params["bn2"])
    y = conv(y, params["w3"]) * s2 + b2
    y = jnp.maximum(y, 0.0)

    Ct = params["w5"].shape[-1]
    y = conv(y, params["w5"].reshape(1, 1, Cmid, Ct))
    return jnp.transpose(y, (0, 3, 1, 2))


# ----------------------------------------------------------------------------
# Main
# ----------------------------------------------------------------------------
if __name__ == "__main__":
    # Proj(num_input_channels=32, num_target_channels=16) -> Cmid = 32.
    N, Cin, H, W = 2, 32, 8, 8
    Ct = 16
    Cmid = 2 * Ct

    key = jax.random.PRNGKey(0)
    keys = jax.random.split(key, 10)

    x = jax.random.normal(keys[0], (N, Cin, H, W), jnp.float32)

    params = {
        # conv1x1: (Cin, Cmid)
        "w1": jax.random.normal(keys[1], (Cin, Cmid), jnp.float32) / jnp.sqrt(Cin),
        # conv3x3: HWIO (3, 3, Cmid, Cmid)
        "w3": jax.random.normal(keys[2], (3, 3, Cmid, Cmid), jnp.float32)
              / jnp.sqrt(9.0 * Cmid),
        # conv1x1: (Cmid, Ct)
        "w5": jax.random.normal(keys[3], (Cmid, Ct), jnp.float32) / jnp.sqrt(Cmid),
        # BN params: (gamma, beta, running_mean, running_var) -- eval mode
        "bn1": (
            1.0 + 0.1 * jax.random.normal(keys[4], (Cmid,), jnp.float32),
            0.1 * jax.random.normal(keys[5], (Cmid,), jnp.float32),
            0.05 * jax.random.normal(keys[6], (Cmid,), jnp.float32),
            0.5 + jnp.abs(jax.random.normal(keys[7], (Cmid,), jnp.float32)),
        ),
        "bn2": (
            1.0 + 0.1 * jax.random.normal(keys[8], (Cmid,), jnp.float32),
            0.1 * jax.random.normal(keys[9], (Cmid,), jnp.float32),
            jnp.zeros((Cmid,), jnp.float32),
            jnp.ones((Cmid,), jnp.float32),
        ),
    }

    out = jax.jit(proj_forward)(x, params)
    out = jax.block_until_ready(out)
    assert out.shape == (N, Ct, H, W), out.shape

    # Sanity check vs f32 XLA conv reference (kernel runs bf16 MXU passes
    # with f32 accumulation, so the tolerance is loose).
    ref = jax.jit(proj_reference)(x, params)
    ref = jax.block_until_ready(ref)
    max_diff = float(jnp.max(jnp.abs(out - ref)))
    assert max_diff < 0.15, f"max diff too large: {max_diff}"

    print("KERNEL_OK")
</pallas_src>

<mosaic_0001>
module attributes {stable_mosaic.version = 11 : i64} {
  func.func @_proj_fused_kernel(%arg0: i32, %arg1: memref<1x8x8x32xbf16, #tpu.memory_space<vmem>>, %arg2: memref<32x32xbf16, #tpu.memory_space<vmem>>, %arg3: memref<2x32xf32, #tpu.memory_space<vmem>>, %arg4: memref<9x32x32xbf16, #tpu.memory_space<vmem>>, %arg5: memref<32x16xbf16, #tpu.memory_space<vmem>>, %arg6: memref<1x8x8x16xf32, #tpu.memory_space<vmem>>, %arg7: memref<10x10x32xbf16, #tpu.memory_space<vmem>>) attributes {dimension_semantics = [#tpu.dimension_semantics<parallel>], iteration_bounds = array<i64: 2>, scalar_prefetch = 0 : i64, scratch_operands = 1 : i64, tpu.core_type = #tpu.core_type<tc>, window_params = [{transform_indices = @transform_0, window_bounds = array<i64: 1, 8, 8, 32>}, {pipeline_mode = #tpu.pipeline_mode<synchronous>, transform_indices = @transform_1, window_bounds = array<i64: 32, 32>}, {pipeline_mode = #tpu.pipeline_mode<synchronous>, transform_indices = @transform_2, window_bounds = array<i64: 2, 32>}, {pipeline_mode = #tpu.pipeline_mode<synchronous>, transform_indices = @transform_3, window_bounds = array<i64: 9, 32, 32>}, {pipeline_mode = #tpu.pipeline_mode<synchronous>, transform_indices = @transform_4, window_bounds = array<i64: 32, 16>}, {transform_indices = @transform_5, window_bounds = array<i64: 1, 8, 8, 16>}]} {
    %c0 = arith.constant 0 : index
    %c0_0 = arith.constant 0 : index
    %c0_1 = arith.constant 0 : index
    %c0_2 = arith.constant 0 : index
    %0 = vector.load %arg1[%c0, %c0_0, %c0_1, %c0_2] : memref<1x8x8x32xbf16, #tpu.memory_space<vmem>>, vector<1x8x8x32xbf16>
    %1 = vector.shape_cast %0 : vector<1x8x8x32xbf16> to vector<8x8x32xbf16>
    %2 = vector.shape_cast %1 : vector<8x8x32xbf16> to vector<64x32xbf16>
    %c0_3 = arith.constant 0 : index
    %c0_4 = arith.constant 0 : index
    %3 = vector.load %arg2[%c0_3, %c0_4] : memref<32x32xbf16, #tpu.memory_space<vmem>>, vector<32x32xbf16>
    %cst = arith.constant dense<0.000000e+00> : vector<64x32xf32>
    %4 = tpu.matmul %2, %3, %cst {dimension_numbers = #tpu.dot_dimension_numbers<[1], [0], [0], [1], [0, 0, 1, 1], [], []>} : vector<64x32xbf16>, vector<32x32xbf16>, vector<64x32xf32> -> vector<64x32xf32>
    %c0_5 = arith.constant 0 : index
    %c0_6 = arith.constant 0 : index
    %5 = vector.load %arg3[%c0_5, %c0_6] : memref<2x32xf32, #tpu.memory_space<vmem>>, vector<1x32xf32>
    %6 = vector.broadcast %5 : vector<1x32xf32> to vector<64x32xf32>
    %7 = arith.addf %4, %6 : vector<64x32xf32>
    %cst_7 = arith.constant 0.000000e+00 : f32
    %8 = vector.broadcast %cst_7 : f32 to vector<64x32xf32>
    %9 = arith.maximumf %7, %8 : vector<64x32xf32>
    %cst_8 = arith.constant 0.000000e+00 : bf16
    %10 = vector.broadcast %cst_8 : bf16 to vector<10x10x32xbf16>
    %c0_9 = arith.constant 0 : index
    %c0_10 = arith.constant 0 : index
    %c0_11 = arith.constant 0 : index
    %11 = vector.load %arg7[%c0_9, %c0_10, %c0_11] : memref<10x10x32xbf16, #tpu.memory_space<vmem>>, vector<10x10x32xbf16>
    tpu.vector_store %arg7[%c0_9, %c0_10, %c0_11], %10 {strides = array<i32>} : memref<10x10x32xbf16, #tpu.memory_space<vmem>>, vector<10x10x32xbf16>,
    %12 = arith.truncf %9 : vector<64x32xf32> to vector<64x32xbf16>
    %13 = vector.shape_cast %12 : vector<64x32xbf16> to vector<8x8x32xbf16>
    %c1 = arith.constant 1 : index
    %c1_12 = arith.constant 1 : index
    %c0_13 = arith.constant 0 : index
    %14 = vector.load %arg7[%c1, %c1_12, %c0_13] : memref<10x10x32xbf16, #tpu.memory_space<vmem>>, vector<8x8x32xbf16>
    tpu.vector_store %arg7[%c1, %c1_12, %c0_13], %13 {strides = array<i32>} : memref<10x10x32xbf16, #tpu.memory_space<vmem>>, vector<8x8x32xbf16>,
    %cst_14 = arith.constant 0.000000e+00 : f32
    %15 = vector.broadcast %cst_14 : f32 to vector<64x32xf32>
    %c0_15 = arith.constant 0 : index
    %c0_16 = arith.constant 0 : index
    %c0_17 = arith.constant 0 : index
    %16 = vector.load %arg7[%c0_15, %c0_16, %c0_17] : memref<10x10x32xbf16, #tpu.memory_space<vmem>>, vector<8x8x32xbf16>
    %17 = vector.shape_cast %16 : vector<8x8x32xbf16> to vector<64x32xbf16>
    %c0_18 = arith.constant 0 : index
    %c0_19 = arith.constant 0 : index
    %c0_20 = arith.constant 0 : index
    %18 = vector.load %arg4[%c0_18, %c0_19, %c0_20] : memref<9x32x32xbf16, #tpu.memory_space<vmem>>, vector<1x32x32xbf16>
    %19 = vector.shape_cast %18 : vector<1x32x32xbf16> to vector<32x32xbf16>
    %cst_21 = arith.constant dense<0.000000e+00> : vector<64x32xf32>
    %20 = tpu.matmul %17, %19, %cst_21 {dimension_numbers = #tpu.dot_dimension_numbers<[1], [0], [0], [1], [0, 0, 1, 1], [], []>} : vector<64x32xbf16>, vector<32x32xbf16>, vector<64x32xf32> -> vector<64x32xf32>
    %21 = arith.addf %15, %20 : vector<64x32xf32>
    %c0_22 = arith.constant 0 : index
    %c1_23 = arith.constant 1 : index
    %c0_24 = arith.constant 0 : index
    %22 = vector.load %arg7[%c0_22, %c1_23, %c0_24] : memref<10x10x32xbf16, #tpu.memory_space<vmem>>, vector<8x8x32xbf16>
    %23 = vector.shape_cast %22 : vector<8x8x32xbf16> to vector<64x32xbf16>
    %c1_25 = arith.constant 1 : index
    %c0_26 = arith.constant 0 : index
    %c0_27 = arith.constant 0 : index
    %24 = vector.load %arg4[%c1_25, %c0_26, %c0_27] : memref<9x32x32xbf16, #tpu.memory_space<vmem>>, vector<1x32x32xbf16>
    %25 = vector.shape_cast %24 : vector<1x32x32xbf16> to vector<32x32xbf16>
    %cst_28 = arith.constant dense<0.000000e+00> : vector<64x32xf32>
    %26 = tpu.matmul %23, %25, %cst_28 {dimension_numbers = #tpu.dot_dimension_numbers<[1], [0], [0], [1], [0, 0, 1, 1], [], []>} : vector<64x32xbf16>, vector<32x32xbf16>, vector<64x32xf32> -> vector<64x32xf32>
    %27 = arith.addf %21, %26 : vector<64x32xf32>
    %c0_29 = arith.constant 0 : index
    %c2 = arith.constant 2 : index
    %c0_30 = arith.constant 0 : index
    %28 = vector.load %arg7[%c0_29, %c2, %c0_30] : memref<10x10x32xbf16, #tpu.memory_space<vmem>>, vector<8x8x32xbf16>
    %29 = vector.shape_cast %28 : vector<8x8x32xbf16> to vector<64x32xbf16>
    %c2_31 = arith.constant 2 : index
    %c0_32 = arith.constant 0 : index
    %c0_33 = arith.constant 0 : index
    %30 = vector.load %arg4[%c2_31, %c0_32, %c0_33] : memref<9x32x32xbf16, #tpu.memory_space<vmem>>, vector<1x32x32xbf16>
    %31 = vector.shape_cast %30 : vector<1x32x32xbf16> to vector<32x32xbf16>
    %cst_34 = arith.constant dense<0.000000e+00> : vector<64x32xf32>
    %32 = tpu.matmul %29, %31, %cst_34 {dimension_numbers = #tpu.dot_dimension_numbers<[1], [0], [0], [1], [0, 0, 1, 1], [], []>} : vector<64x32xbf16>, vector<32x32xbf16>, vector<64x32xf32> -> vector<64x32xf32>
    %33 = arith.addf %27, %32 : vector<64x32xf32>
    %c1_35 = arith.constant 1 : index
    %c0_36 = arith.constant 0 : index
    %c0_37 = arith.constant 0 : index
    %34 = vector.load %arg7[%c1_35, %c0_36, %c0_37] : memref<10x10x32xbf16, #tpu.memory_space<vmem>>, vector<8x8x32xbf16>
    %35 = vector.shape_cast %34 : vector<8x8x32xbf16> to vector<64x32xbf16>
    %c3 = arith.constant 3 : index
    %c0_38 = arith.constant 0 : index
    %c0_39 = arith.constant 0 : index
    %36 = vector.load %arg4[%c3, %c0_38, %c0_39] : memref<9x32x32xbf16, #tpu.memory_space<vmem>>, vector<1x32x32xbf16>
    %37 = vector.shape_cast %36 : vector<1x32x32xbf16> to vector<32x32xbf16>
    %cst_40 = arith.constant dense<0.000000e+00> : vector<64x32xf32>
    %38 = tpu.matmul %35, %37, %cst_40 {dimension_numbers = #tpu.dot_dimension_numbers<[1], [0], [0], [1], [0, 0, 1, 1], [], []>} : vector<64x32xbf16>, vector<32x32xbf16>, vector<64x32xf32> -> vector<64x32xf32>
    %39 = arith.addf %33, %38 : vector<64x32xf32>
    %c1_41 = arith.constant 1 : index
    %c1_42 = arith.constant 1 : index
    %c0_43 = arith.constant 0 : index
    %40 = vector.load %arg7[%c1_41, %c1_42, %c0_43] : memref<10x10x32xbf16, #tpu.memory_space<vmem>>, vector<8x8x32xbf16>
    %41 = vector.shape_cast %40 : vector<8x8x32xbf16> to vector<64x32xbf16>
    %c4 = arith.constant 4 : index
    %c0_44 = arith.constant 0 : index
    %c0_45 = arith.constant 0 : index
    %42 = vector.load %arg4[%c4, %c0_44, %c0_45] : memref<9x32x32xbf16, #tpu.memory_space<vmem>>, vector<1x32x32xbf16>
    %43 = vector.shape_cast %42 : vector<1x32x32xbf16> to vector<32x32xbf16>
    %cst_46 = arith.constant dense<0.000000e+00> : vector<64x32xf32>
    %44 = tpu.matmul %41, %43, %cst_46 {dimension_numbers = #tpu.dot_dimension_numbers<[1], [0], [0], [1], [0, 0, 1, 1], [], []>} : vector<64x32xbf16>, vector<32x32xbf16>, vector<64x32xf32> -> vector<64x32xf32>
    %45 = arith.addf %39, %44 : vector<64x32xf32>
    %c1_47 = arith.constant 1 : index
    %c2_48 = arith.constant 2 : index
    %c0_49 = arith.constant 0 : index
    %46 = vector.load %arg7[%c1_47, %c2_48, %c0_49] : memref<10x10x32xbf16, #tpu.memory_space<vmem>>, vector<8x8x32xbf16>
    %47 = vector.shape_cast %46 : vector<8x8x32xbf16> to vector<64x32xbf16>
    %c5 = arith.constant 5 : index
    %c0_50 = arith.constant 0 : index
    %c0_51 = arith.constant 0 : index
    %48 = vector.load %arg4[%c5, %c0_50, %c0_51] : memref<9x32x32xbf16, #tpu.memory_space<vmem>>, vector<1x32x32xbf16>
    %49 = vector.shape_cast %48 : vector<1x32x32xbf16> to vector<32x32xbf16>
    %cst_52 = arith.constant dense<0.000000e+00> : vector<64x32xf32>
    %50 = tpu.matmul %47, %49, %cst_52 {dimension_numbers = #tpu.dot_dimension_numbers<[1], [0], [0], [1], [0, 0, 1, 1], [], []>} : vector<64x32xbf16>, vector<32x32xbf16>, vector<64x32xf32> -> vector<64x32xf32>
    %51 = arith.addf %45, %50 : vector<64x32xf32>
    %c2_53 = arith.constant 2 : index
    %c0_54 = arith.constant 0 : index
    %c0_55 = arith.constant 0 : index
    %52 = vector.load %arg7[%c2_53, %c0_54, %c0_55] : memref<10x10x32xbf16, #tpu.memory_space<vmem>>, vector<8x8x32xbf16>
    %53 = vector.shape_cast %52 : vector<8x8x32xbf16> to vector<64x32xbf16>
    %c6 = arith.constant 6 : index
    %c0_56 = arith.constant 0 : index
    %c0_57 = arith.constant 0 : index
    %54 = vector.load %arg4[%c6, %c0_56, %c0_57] : memref<9x32x32xbf16, #tpu.memory_space<vmem>>, vector<1x32x32xbf16>
    %55 = vector.shape_cast %54 : vector<1x32x32xbf16> to vector<32x32xbf16>
    %cst_58 = arith.constant dense<0.000000e+00> : vector<64x32xf32>
    %56 = tpu.matmul %53, %55, %cst_58 {dimension_numbers = #tpu.dot_dimension_numbers<[1], [0], [0], [1], [0, 0, 1, 1], [], []>} : vector<64x32xbf16>, vector<32x32xbf16>, vector<64x32xf32> -> vector<64x32xf32>
    %57 = arith.addf %51, %56 : vector<64x32xf32>
    %c2_59 = arith.constant 2 : index
    %c1_60 = arith.constant 1 : index
    %c0_61 = arith.constant 0 : index
    %58 = vector.load %arg7[%c2_59, %c1_60, %c0_61] : memref<10x10x32xbf16, #tpu.memory_space<vmem>>, vector<8x8x32xbf16>
    %59 = vector.shape_cast %58 : vector<8x8x32xbf16> to vector<64x32xbf16>
    %c7 = arith.constant 7 : index
    %c0_62 = arith.constant 0 : index
    %c0_63 = arith.constant 0 : index
    %60 = vector.load %arg4[%c7, %c0_62, %c0_63] : memref<9x32x32xbf16, #tpu.memory_space<vmem>>, vector<1x32x32xbf16>
    %61 = vector.shape_cast %60 : vector<1x32x32xbf16> to vector<32x32xbf16>
    %cst_64 = arith.constant dense<0.000000e+00> : vector<64x32xf32>
    %62 = tpu.matmul %59, %61, %cst_64 {dimension_numbers = #tpu.dot_dimension_numbers<[1], [0], [0], [1], [0, 0, 1, 1], [], []>} : vector<64x32xbf16>, vector<32x32xbf16>, vector<64x32xf32> -> vector<64x32xf32>
    %63 = arith.addf %57, %62 : vector<64x32xf32>
    %c2_65 = arith.constant 2 : index
    %c2_66 = arith.constant 2 : index
    %c0_67 = arith.constant 0 : index
    %64 = vector.load %arg7[%c2_65, %c2_66, %c0_67] : memref<10x10x32xbf16, #tpu.memory_space<vmem>>, vector<8x8x32xbf16>
    %65 = vector.shape_cast %64 : vector<8x8x32xbf16> to vector<64x32xbf16>
    %c8 = arith.constant 8 : index
    %c0_68 = arith.constant 0 : index
    %c0_69 = arith.constant 0 : index
    %66 = vector.load %arg4[%c8, %c0_68, %c0_69] : memref<9x32x32xbf16, #tpu.memory_space<vmem>>, vector<1x32x32xbf16>
    %67 = vector.shape_cast %66 : vector<1x32x32xbf16> to vector<32x32xbf16>
    %cst_70 = arith.constant dense<0.000000e+00> : vector<64x32xf32>
    %68 = tpu.matmul %65, %67, %cst_70 {dimension_numbers = #tpu.dot_dimension_numbers<[1], [0], [0], [1], [0, 0, 1, 1], [], []>} : vector<64x32xbf16>, vector<32x32xbf16>, vector<64x32xf32> -> vector<64x32xf32>
    %69 = arith.addf %63, %68 : vector<64x32xf32>
    %c1_71 = arith.constant 1 : index
    %c0_72 = arith.constant 0 : index
    %70 = vector.load %arg3[%c1_71, %c0_72] : memref<2x32xf32, #tpu.memory_space<vmem>>, vector<1x32xf32>
    %71 = vector.broadcast %70 : vector<1x32xf32> to vector<64x32xf32>
    %72 = arith.addf %69, %71 : vector<64x32xf32>
    %cst_73 = arith.constant 0.000000e+00 : f32
    %73 = vector.broadcast %cst_73 : f32 to vector<64x32xf32>
    %74 = arith.maximumf %72, %73 : vector<64x32xf32>
    %75 = arith.truncf %74 : vector<64x32xf32> to vector<64x32xbf16>
    %c0_74 = arith.constant 0 : index
    %c0_75 = arith.constant 0 : index
    %76 = vector.load %arg5[%c0_74, %c0_75] : memref<32x16xbf16, #tpu.memory_space<vmem>>, vector<32x16xbf16>
    %cst_76 = arith.constant dense<0.000000e+00> : vector<64x16xf32>
    %77 = tpu.matmul %75, %76, %cst_76 {dimension_numbers = #tpu.dot_dimension_numbers<[1], [0], [0], [1], [0, 0, 1, 1], [], []>} : vector<64x32xbf16>, vector<32x16xbf16>, vector<64x16xf32> -> vector<64x16xf32>
    %78 = vector.shape_cast %77 : vector<64x16xf32> to vector<8x8x16xf32>
    %c0_77 = arith.constant 0 : index
    %c0_78 = arith.constant 0 : index
    %c0_79 = arith.constant 0 : index
    %c0_80 = arith.constant 0 : index
    %79 = vector.load %arg6[%c0_77, %c0_78, %c0_79, %c0_80] : memref<1x8x8x16xf32, #tpu.memory_space<vmem>>, vector<1x8x8x16xf32>
    %80 = vector.shape_cast %79 : vector<1x8x8x16xf32> to vector<8x8x16xf32>
    %81 = vector.shape_cast %78 : vector<8x8x16xf32> to vector<1x8x8x16xf32>
    tpu.vector_store %arg6[%c0_77, %c0_78, %c0_79, %c0_80], %81 {strides = array<i32>} : memref<1x8x8x16xf32, #tpu.memory_space<vmem>>, vector<1x8x8x16xf32>,
    return
  }
  func.func @transform_0(%arg0: i32) -> (i32, i32, i32, i32) {
    %c0_i32 = arith.constant 0 : i32
    %c0_i32_0 = arith.constant 0 : i32
    %c0_i32_1 = arith.constant 0 : i32
    %c0_i32_2 = arith.constant 0 : i32
    return %arg0, %c0_i32, %c0_i32_0, %c0_i32_1 : i32, i32, i32, i32
  }
  func.func @transform_1(%arg0: i32) -> (i32, i32) {
    %c0_i32 = arith.constant 0 : i32
    %c0_i32_0 = arith.constant 0 : i32
    %c0_i32_1 = arith.constant 0 : i32
    return %c0_i32, %c0_i32_0 : i32, i32
  }
  func.func @transform_2(%arg0: i32) -> (i32, i32) {
    %c0_i32 = arith.constant 0 : i32
    %c0_i32_0 = arith.constant 0 : i32
    %c0_i32_1 = arith.constant 0 : i32
    return %c0_i32, %c0_i32_0 : i32, i32
  }
  func.func @transform_3(%arg0: i32) -> (i32, i32, i32) {
    %c0_i32 = arith.constant 0 : i32
    %c0_i32_0 = arith.constant 0 : i32
    %c0_i32_1 = arith.constant 0 : i32
    %c0_i32_2 = arith.constant 0 : i32
    return %c0_i32, %c0_i32_0, %c0_i32_1 : i32, i32, i32
  }
  func.func @transform_4(%arg0: i32) -> (i32, i32) {
    %c0_i32 = arith.constant 0 : i32
    %c0_i32_0 = arith.constant 0 : i32
    %c0_i32_1 = arith.constant 0 : i32
    return %c0_i32, %c0_i32_0 : i32, i32
  }
  func.func @transform_5(%arg0: i32) -> (i32, i32, i32, i32) {
    %c0_i32 = arith.constant 0 : i32
    %c0_i32_0 = arith.constant 0 : i32
    %c0_i32_1 = arith.constant 0 : i32
    %c0_i32_2 = arith.constant 0 : i32
    return %arg0, %c0_i32, %c0_i32_0, %c0_i32_1 : i32, i32, i32, i32
  }
}

</mosaic_0001>

<bundles_post_ra>
// kernel: proj_forward.1
= control target key start
LH: loop header
LB: loop body
LE: loop exit
PB: predicated region body
PF: predicated region fallthrough
CT: control target
= control target key end

     0   :  { %10 = vsyncpa [#allocation4], 0  ;;  %s2872_s0 = inlined_call_operand.vmem [shape: bf16[2,8,8,32], index: 0, kind: input, shape index: {}]   ;;  %s2873_s1 = inlined_call_operand.vmem [shape: bf16[32,32], index: 1, kind: input, shape index: {}]   ;;  %s2874_s2 = inlined_call_operand.vmem [shape: f32[2,32], index: 2, kind: input, shape index: {}]   ;;  %s2875_s3 = inlined_call_operand.vmem [shape: bf16[9,32,32], index: 3, kind: input, shape index: {}]   ;;  %s2876_s4 = inlined_call_operand.vmem [shape: bf16[32,16], index: 4, kind: input, shape index: {}]   ;;  %s2877_s5 = inlined_call_operand.hbm [shape: f32[2,8,8,16], index: 5, kind: output, shape index: {}]  }
   0x1   :  { %12 = vsyncpa [#allocation4 + $0x1], 0  ;;  %s2386_s18 = smov 0   ;;  %s2388_s19 = smov 0  }
   0x2   :  { %s2390_s20 = smov 0   ;;  %s2392_s21 = smov 0  }
   0x3 LB: > { %s2407_s22 = sadd.s32 4294967295, %s2351_s21   ;;  %s1935_s23 = sadd.s32 4294967294, %s2351_s21   ;;  %s2351_s21 = sphi %s2392_s21, %s2891_s21   ;;  %s2347_s20 = sphi %s2390_s20, %s2890_s20   ;;  %s2343_s19 = sphi %s2388_s19, %s2889_s19   ;;  %s2339_s18 = sphi %s2386_s18, %s2888_s18  }
   0x4   : > { %s2411_s24 = sadd.s32 1, %s2351_s21   ;;  %s135_s25 = sadd.s32 1, %s2347_s20 }
   0x5   : > { %s132_s26 = ssub.s32 %s2351_s21, %s2411_s24  ;;  %p145_p0 = scmp.ne.s32.totalorder %s2347_s20, %s2343_s19 }
   0x6   : > { %p133_p1 = scmp.eq.s32.totalorder %s132_s26, 0  ;;  %p146_p2 = scmp.eq.s32.totalorder %s2407_s22, 1 }
   0x7   : > { %p151_p3 = scmp.ne.s32.totalorder %s2343_s19, %s2339_s18  ;;  %p152_p4 = scmp.eq.s32.totalorder %s1935_s23, 1 }
   0x8   : > { %s2422_s27 = scalar_select %p133_p1, %s2347_s20, %s135_s25  }
   0x9   : > { %p2424_p5 = por %p146_p2, %p145_p0  ;;  %p2428_p6 = por %p152_p4, %p151_p3 }
   0xa   : > { %p1938_p7 = scmp.ge.s32.totalorder %s2351_s21, 1  ;;  %p190_p8 = scmp.lt.s32.totalorder %s2351_s21, 3 }
   0xc   : > { %p191_p9 = pnand %p1938_p7, %p190_p8 }
   0xd   : > { %p218_p10 = scmp.lt.s32.totalorder (!%p191_p9), %s2407_s22, 1  ;;  %s2309_s7 = scalar_lea.hbm (!%p191_p9), %s2877_s5, 128 }
   0xe   : > { %194 = sbr.rel (%p191_p9) target bundleno = 644 (0x284), region = 40 }
  0x13   : > { %v2205_v0 = vld [vmem:[%s2873_s1 + $0x8] sm:$0xff]  ;;  %v2204_v1 = vld [vmem:[%s2873_s1] sm:$0xff]  ;;  %s219_s9 = scalar_select %p218_p10, %s2407_s22, 1  ;;  %vm270_vm0 = vcmask 261120   ;;  %vm320_vm1 = vcmask 257024   ;;  %vm322_vm2 = vcmask 253952  }
  0x14   : > { %289 = vmatpush.bf16.msra.mxu0 %v2205_v0  ;;  %2239 = vmatpush.bf16.msra.mxu3 %v2205_v0  ;;  %v2353_v6 = vmov 0   ;;  %v2215_v7 = vld [vmem:[%s2875_s3 + $0x28] sm:$0xff]  ;;  %v2214_v9 = vld [vmem:[%s2875_s3 + $0x20] sm:$0xff]  ;;  %v2213_v10 = vld [vmem:[%s2875_s3 + $0x18] sm:$0xff]  ;;  %vm432_vm3 = vsmask.f32 7938 }
  0x15   : > { %s2199_s10 = sshll.u32 %s219_s9, 5  ;;  %324 = vst.msk [vmem:[#allocation2 + $0x8] sm:$0xf] %vm320_vm1, %v2353_v6  ;;  %v2211_v8 = vld [vmem:[%s2875_s3 + $0x8] sm:$0xff]  ;;  %v2484_v11 = vld [vmem:[%s2874_s2] ss:$0 sm:$0xff]  ;;  %2241 = vmatpush.bf16.msra.mxu1 %v2213_v10  ;;  %vm2495_vm5 = vmand %vm320_vm1, %vm432_vm3 }
  0x16   : > { %s222_s13 = scalar_lea.vmem %s2872_s0, %s2199_s10  ;;  %325 = vst.msk [vmem:[#allocation2 + $0xc] sm:$0x1] %vm322_vm2, %v2353_v6  ;;  %2243 = vmatpush.bf16.msra.mxu2 %v2211_v8  ;;  %v2210_v12 = vld [vmem:[%s2875_s3] sm:$0xff]  ;;  %v2212_v14 = vld [vmem:[%s2875_s3 + $0x10] sm:$0xff]  ;;  %vm438_vm4 = vsmask.f32 256 }
  0x17   : > { %v2200_v2 = vld [vmem:[%s222_s13] sm:$0xff]  ;;  %v2201_v3 = vld [vmem:[%s222_s13 + $0x8] sm:$0xff]  ;;  %v2202_v4 = vld [vmem:[%s222_s13 + $0x10] sm:$0xff]  ;;  %321 = vst.msk [vmem:[#allocation2] sm:$0xf] %vm320_vm1, %v2353_v6  ;;  %vm787_vm7 = vcmask 1042432  }
  0x18   : > { %290 = vmatpush.bf16.msra.mxu0 %v2204_v1  ;;  %2240 = vmatpush.bf16.msra.mxu3 %v2204_v1  ;;  %v2203_v5 = vld [vmem:[%s222_s13 + $0x18] sm:$0xff]  ;;  %323 = vst.msk [vmem:[#allocation2 + $0x4] sm:$0x1] %vm322_vm2, %v2353_v6  ;;  %vm2501_vm6 = vmand %vm322_vm2, %vm438_vm4  ;;  %vm788_vm8 = vcmask 1046532   ;;  %vm505_vm10 = vsmask.f32 3328 }
  0x19   : > { %326 = vst.msk [vmem:[#allocation2 + $0x10] sm:$0xf] %vm320_vm1, %v2353_v6  ;;  %2242 = vmatpush.bf16.msra.mxu1 %v2212_v14  ;;  %vm2510_vm9 = vmor %vm787_vm7, %vm788_vm8  ;;  %vm506_vm11 = vsmask.f32 7440  ;;  %v2235_v27 = vld [vmem:[%s2875_s3 + $0x88] sm:$0xff]  ;;  %s215_s10 = sand.u32 1, %s2343_s19  }
  0x1a   : > { %327 = vst.msk [vmem:[#allocation2 + $0x14] sm:$0x1] %vm322_vm2, %v2353_v6  ;;  %2244 = vmatpush.bf16.msra.mxu2 %v2210_v12  ;;  %vm2530_vm12 = vmor %vm505_vm10, %vm506_vm11  ;;  %s1939_s11 = sshll.u32 %s215_s10, 6  ;;  %vm1848_vm13 = vcmask 130048   ;;  %s2238_s13 = sshll.u32 %s2407_s22, 6 }
  0x1b   : > { %1966 = vmatmul.msk.bf16.vlgmr.msra.gmra.mxu0 %vm270_vm0, %v2200_v2  ;;  %1967 = vmatmul.msk.bf16.vlgmr.msra.gmra.mxu3 %vm270_vm0, %v2201_v3  ;;  %328 = vst.msk [vmem:[#allocation2 + $0x18] sm:$0xf] %vm320_vm1, %v2353_v6  ;;  %s217_s12 = scalar_lea.vmem [#allocation3], %s1939_s11  ;;  %s1869_s16 = scalar_lea.hbm %s2877_s5, %s2238_s13 }
  0x1c   : > { %329 = vst.msk [vmem:[#allocation2 + $0x1c] sm:$0x1] %vm322_vm2, %v2353_v6  ;;  %869 = vmatpush.bf16.msrb.mxu3 %v2215_v7  ;;  %667 = vmatpush.bf16.msrb.mxu0 %v2213_v10  ;;  %v434_v30 = vld [vmem:[#allocation2 + $0x8] sm:$0xf]  ;;  %s1870_s17 = sshll.u32 %s217_s12, 4  ;;  %s1872_s23 = sshll.u32 %s1869_s16, 4  ;;  %s1871_s17 = int_to_ptr.vmem [resolvable:$true] %s1870_s17  ;;  %s1873_s23 = int_to_ptr.hbm [resolvable:$true] %s1872_s23 }
  0x1d   : > { %330 = vst.msk [vmem:[#allocation2 + $0x20] sm:$0xf] %vm320_vm1, %v2353_v6  ;;  %v440_v32 = vld [vmem:[#allocation2 + $0xc] sm:$0x1]  ;;  %s1858_s25 = scalar_lea.sflag [#allocation4], %s215_s10  ;;  %s2303_s26 = sshra.s32 %s1873_s23, 4  ;;  %s2304_s26 = int_to_ptr.hbm [resolvable:$true] %s2303_s26 }
  0x1e   : > { %331 = vst.msk [vmem:[#allocation2 + $0x24] sm:$0x1] %vm322_vm2, %v2353_v6  ;;  %v485_v18 = vld [vmem:[#allocation2] sm:$0xf]  ;;  %s2305_s30 = scalar_lea.hbm %s2304_s26, 64  ;;  %p2310_p0 = scmp.lt.s32.totalorder %s2304_s26, %s2877_s5 }
  0x1f   : > { %332 = vst.msk [vmem:[#allocation2 + $0x28] sm:$0xf] %vm320_vm1, %v2353_v6  ;;  %v509_v23 = vshrl.u32 %v485_v18, 16  ;;  %v512_v24 = vshll.u32 %v485_v18, 16  ;;  %v763_v43 = vld [vmem:[#allocation2] sm:$0xe]  ;;  %p2306_p11 = scmp.ne.s32.totalorder %s2304_s26, %s2305_s30  ;;  %p2311_p1 = scmp.lt.s32.totalorder %s2309_s7, %s2305_s30 }
  0x20   : > { %333 = vst.msk [vmem:[#allocation2 + $0x2c] sm:$0x1] %vm322_vm2, %v2353_v6  ;;  %870 = vmatpush.bf16.msrb.mxu3 %v2214_v9  ;;  %668 = vmatpush.bf16.msrb.mxu0 %v2212_v14  ;;  %v497_v47 = vld [vmem:[#allocation2 + $0x4] sm:$0x1]  ;;  %v2014_v52 = vrot.slane %v763_v43, 9 }
  0x21   : > { %334 = vst.msk [vmem:[#allocation2 + $0x30] sm:$0xf] %vm320_vm1, %v2353_v6  ;;  %v511_v37 = vrot.slane %v509_v23, 4  ;;  %v514_v38 = vrot.slane %v512_v24, 5  ;;  %v518_v54 = vshll.u32 %v497_v47, 16  ;;  %v792_v58 = vrot.slane %v497_v47, 5  ;;  %p2307_p12 = pnand %p2306_p11, %p2424_p5  ;;  %p2312_p2 = por %p2311_p1, %p2310_p0 }
  0x22   : > { %335 = vst.msk [vmem:[#allocation2 + $0x34] sm:$0x1] %vm322_vm2, %v2353_v6  ;;  %v449_v44 = vld [vmem:[#allocation2 + $0x18] sm:$0xf]  ;;  %v443_v0 = vld [vmem:[#allocation2 + $0x10] sm:$0xf] }
  0x23   : > { %336 = vst.msk [vmem:[#allocation2 + $0x38] sm:$0xf] %vm320_vm1, %v2353_v6  ;;  %v452_v50 = vld [vmem:[#allocation2 + $0x1c] sm:$0x1]  ;;  %v515_v53 = vor.u32 %v514_v38, %v511_v37  ;;  %v446_v1 = vld [vmem:[#allocation2 + $0x14] sm:$0x1]  ;;  %v793_v10 = vsel %vm2510_vm9, %v2014_v52, %v792_v58  ;;  %p2308_p13 = pneg %p2307_p12 }
  0x24   : > { %337 = vst.msk [vmem:[#allocation2 + $0x3c] sm:$0x1] %vm322_vm2, %v2353_v6  ;;  %740 = vmatpush.bf16.msra.mxu0 %v2211_v8  ;;  %v455_v14 = vld [vmem:[#allocation2 + $0x20] sm:$0xf] }
  0x25   : > { %338 = vst.msk [vmem:[#allocation2 + $0x40] sm:$0xf] %vm320_vm1, %v2353_v6  ;;  %v458_v24 = vld [vmem:[#allocation2 + $0x24] sm:$0x1]  ;;  %p2313_p3 = pnand %p2312_p2, %p2308_p13 }
  0x26   : > { %339 = vst.msk [vmem:[#allocation2 + $0x44] sm:$0x1] %vm322_vm2, %v2353_v6 }
  0x27   : > { %340 = vst.msk [vmem:[#allocation2 + $0x48] sm:$0xf] %vm320_vm1, %v2353_v6 }
  0x28   : > { %341 = vst.msk [vmem:[#allocation2 + $0x4c] sm:$0x1] %vm322_vm2, %v2353_v6  ;;  %741 = vmatpush.bf16.msra.mxu0 %v2210_v12  ;;  %v520_v6 = vrot.slane %v518_v54, 5 }
  0x2b   : > { %1968 = vmatmul.msk.bf16.gmra.mxu3 %vm270_vm0, %v2202_v4 }
  0x3b   : > { %1969 = vmatmul.msk.bf16.gmra.mxu3 %vm270_vm0, %v2203_v5  ;;  %v516_v5 = vrot.slane %v515_v53, 4  ;;  %v461_v53 = vld [vmem:[#allocation2 + $0x28] sm:$0xf] }
  0x98   : > { %v292_v13 = vpop.f32.mrf.mxu0 }
  0x99   : > { %v293_v15 = vadd.f32 %v2484_v11, %v292_v13 }
  0x9b   : > { %v312_v16 = vmax.f32 %v293_v15, 0.0 }
  0x9d   : > { %v342_v17 = vpack.c.bf16 %v312_v16, %v312_v16 }
  0x9e   : > { %v297_v19 = vpop.f32.mrf.mxu3 }
  0x9f   : > { %v351_v20 = vshrl.u32 %v342_v17, 16  ;;  %v298_v21 = vadd.f32 %v2484_v11, %v297_v19  ;;  %v354_v26 = vshll.u32 %v342_v17, 16  ;;  %v2223_v19 = vld [vmem:[%s2875_s3 + $0x48] sm:$0xff] }
  0xa0   : > { %v294_v22 = vpop.f32.mrf.mxu0  ;;  %1169 = vmatpush.bf16.msrb.mxu1 %v2223_v19 }
  0xa1   : > { %v353_v25 = vrot.slane %v351_v20, 7  ;;  %v314_v28 = vmax.f32 %v298_v21, 0.0  ;;  %v295_v29 = vadd.f32 %v2484_v11, %v294_v22 }
  0xa3   : > { %v356_v33 = vor.u32 %v354_v26, %v353_v25  ;;  %v357_v34 = vrot.slane %v353_v25, 4  ;;  %v344_v35 = vpack.c.bf16 %v314_v28, %v314_v28  ;;  %v313_v36 = vmax.f32 %v295_v29, 0.0 }
  0xa4   : > { %v827_v25 = vunpack.c.l.b16 %v793_v10 }
  0xa5   : > { %v435_v39 = vsel %vm2495_vm5, %v356_v33, %v434_v30  ;;  %v441_v40 = vsel %vm2501_vm6, %v357_v34, %v440_v32  ;;  %v367_v41 = vshrl.u32 %v344_v35, 16  ;;  %v370_v42 = vshll.u32 %v344_v35, 16 }
  0xa6   : > { %436 = vst [vmem:[#allocation2 + $0x8] sm:$0xf] %v435_v39  ;;  %v343_v45 = vpack.c.bf16 %v313_v36, %v313_v36  ;;  %v299_v46 = vpop.f32.mrf.mxu3 }
  0xa7   : > { %442 = vst [vmem:[#allocation2 + $0xc] sm:$0x1] %v441_v40  ;;  %v369_v48 = vrot.slane %v367_v41, 7  ;;  %v300_v49 = vadd.f32 %v2484_v11, %v299_v46  ;;  %v521_v41 = vsel %vm2530_vm12, %v516_v5, %v520_v6 }
  0xa8   : > { %v359_v51 = vshrl.u32 %v343_v45, 16  ;;  %v362_v60 = vshll.u32 %v343_v45, 16 }
  0xa9   : > { %v372_v55 = vor.u32 %v370_v42, %v369_v48  ;;  %v373_v56 = vrot.slane %v369_v48, 4  ;;  %v315_v57 = vmax.f32 %v300_v49, 0.0 }
  0xaa   : > { %v361_v59 = vrot.slane %v359_v51, 7 }
  0xab   : > { %v450_v62 = vsel %vm2495_vm5, %v372_v55, %v449_v44  ;;  %v453_v63 = vsel %vm2501_vm6, %v373_v56, %v452_v50  ;;  %v345_v2 = vpack.c.bf16 %v315_v57, %v315_v57  ;;  %v625_v57 = vunpack.c.l.b16 %v521_v41  ;;  %v2222_v41 = vld [vmem:[%s2875_s3 + $0x40] sm:$0xff] }
  0xac   : > { %451 = vst [vmem:[#allocation2 + $0x18] sm:$0xf] %v450_v62  ;;  %v364_v3 = vor.u32 %v362_v60, %v361_v59  ;;  %v365_v4 = vrot.slane %v361_v59, 4  ;;  %1170 = vmatpush.bf16.msrb.mxu1 %v2222_v41 }
  0xad   : > { %454 = vst [vmem:[#allocation2 + $0x1c] sm:$0x1] %v453_v63  ;;  %v375_v7 = vshrl.u32 %v345_v2, 16  ;;  %v378_v8 = vshll.u32 %v345_v2, 16  ;;  %v764_v9 = vld [vmem:[#allocation2 + $0x8] sm:$0xe] }
  0xae   : > { %v444_v12 = vsel %vm2495_vm5, %v364_v3, %v443_v0  ;;  %v447_v13 = vsel %vm2501_vm6, %v365_v4, %v446_v1  ;;  %v302_v15 = vpop.f32.mrf.mxu3  ;;  %v498_v16 = vld [vmem:[#allocation2 + $0xc] sm:$0x1]  ;;  %v2015_v17 = vrot.slane %v764_v9, 9  ;;  %v486_v18 = vld [vmem:[#allocation2 + $0x8] sm:$0xf] }
  0xaf   : > { %445 = vst [vmem:[#allocation2 + $0x10] sm:$0xf] %v444_v12  ;;  %v377_v20 = vrot.slane %v375_v7, 7  ;;  %v303_v21 = vadd.f32 %v2484_v11, %v302_v15  ;;  %v796_v22 = vrot.slane %v498_v16, 5  ;;  %v523_v23 = vshrl.u32 %v486_v18, 16 }
  0xb0   : > { %448 = vst [vmem:[#allocation2 + $0x14] sm:$0x1] %v447_v13  ;;  %v526_v28 = vshll.u32 %v486_v18, 16  ;;  %v532_v29 = vshll.u32 %v498_v16, 16  ;;  %v464_v3 = vld [vmem:[#allocation2 + $0x2c] sm:$0x1] }
  0xb1   : > { %v380_v30 = vor.u32 %v378_v8, %v377_v20  ;;  %v381_v32 = vrot.slane %v377_v20, 4  ;;  %v316_v33 = vmax.f32 %v303_v21, 0.0  ;;  %v797_v34 = vsel %vm2510_vm9, %v2015_v17, %v796_v22  ;;  %v2221_v18 = vld [vmem:[%s2875_s3 + $0x38] sm:$0xff] }
  0xb2   : > { %v828_v35 = vunpack.c.l.b16 %v797_v34  ;;  %v525_v36 = vrot.slane %v523_v23, 4  ;;  %v528_v37 = vrot.slane %v526_v28, 5  ;;  %v534_v51 = vrot.slane %v532_v29, 5 }
  0xb3   : > { %v456_v38 = vsel %vm2495_vm5, %v380_v30, %v455_v14  ;;  %v459_v39 = vsel %vm2501_vm6, %v381_v32, %v458_v24  ;;  %v346_v40 = vpack.c.bf16 %v316_v33, %v316_v33  ;;  %v488_v42 = vld [vmem:[#allocation2 + $0x18] sm:$0xf] }
  0xb4   : > { %457 = vst [vmem:[#allocation2 + $0x20] sm:$0xf] %v456_v38  ;;  %v835_v43 = vpack.c.b16 %v828_v35, %v827_v25  ;;  %v2207_v44 = vld [vmem:[#allocation2 + $0x14] sm:$0xf0]  ;;  %v529_v45 = vor.u32 %v528_v37, %v525_v36  ;;  %v2542_v46 = vld [vmem:[#allocation2 + $0x1c] sm:$0x1] }
  0xb5   : > { %v551_v47 = vshrl.u32 %v488_v42, 16  ;;  %v554_v48 = vshll.u32 %v488_v42, 16  ;;  %460 = vst [vmem:[#allocation2 + $0x24] sm:$0x1] %v459_v39  ;;  %v383_v49 = vshrl.u32 %v346_v40, 16  ;;  %v386_v50 = vshll.u32 %v346_v40, 16 }
  0xb6   : > { %v560_v52 = vshll.u32 %v2542_v46, 16  ;;  %2034 = vmatmul.msk.bf16.vlgmr.msrb.gmra.mxu3 %vm270_vm0, %v835_v43  ;;  %v304_v54 = vpop.f32.mrf.mxu3  ;;  %v1992_v55 = vld [vmem:[#allocation2 + $0x10] sm:$0xf]  ;;  %v530_v56 = vrot.slane %v529_v45, 4  ;;  %v766_v2 = vld [vmem:[#allocation2 + $0x18] sm:$0xe] }
  0xb7   : > { %v487_v58 = vld [vmem:[#allocation2 + $0x10] sm:$0xf]  ;;  %v553_v59 = vrot.slane %v551_v47, 4  ;;  %v385_v60 = vrot.slane %v383_v49, 7  ;;  %v305_v62 = vadd.f32 %v2484_v11, %v304_v54  ;;  %v1993_v63 = vor.u32 %v2207_v44, %v1992_v55  ;;  %v499_v0 = vld [vmem:[#allocation2 + $0x14] sm:$0x1] }
  0xb8   : > { %v537_v1 = vshrl.u32 %v487_v58, 16  ;;  %v535_v4 = vsel %vm2530_vm12, %v530_v56, %v534_v51  ;;  %v540_v5 = vshll.u32 %v487_v58, 16  ;;  %v546_v6 = vshll.u32 %v499_v0, 16  ;;  %v765_v13 = vld [vmem:[#allocation2 + $0x10] sm:$0xe] }
  0xb9   : > { %v556_v7 = vrot.slane %v554_v48, 5  ;;  %v388_v8 = vor.u32 %v386_v50, %v385_v60  ;;  %v389_v9 = vrot.slane %v385_v60, 4  ;;  %v317_v10 = vmax.f32 %v305_v62, 0.0  ;;  %2011 = vmatmul.msk.bf16.vlgmr.msra.gmra.mxu2 %vm270_vm0, %v1993_v63  ;;  %v2220_v40 = vld [vmem:[%s2875_s3 + $0x30] sm:$0xff] }
  0xba   : > { %v626_v12 = vunpack.c.l.b16 %v535_v4  ;;  %v539_v14 = vrot.slane %v537_v1, 4  ;;  %v542_v15 = vrot.slane %v540_v5, 5  ;;  %v2017_v17 = vrot.slane %v766_v2, 9  ;;  %v467_v47 = vld [vmem:[#allocation2 + $0x30] sm:$0xf] }
  0xbb   : > { %v557_v16 = vor.u32 %v556_v7, %v553_v59  ;;  %v462_v19 = vsel %vm2495_vm5, %v388_v8, %v461_v53  ;;  %v465_v20 = vsel %vm2501_vm6, %v389_v9, %v464_v3  ;;  %v347_v21 = vpack.c.bf16 %v317_v10, %v317_v10  ;;  %v489_v23 = vld [vmem:[#allocation2 + $0x20] sm:$0xf]  ;;  %v470_v48 = vld [vmem:[#allocation2 + $0x34] sm:$0x1]  ;;  %v2206_v4 = vld [vmem:[#allocation2 + $0x4] sm:$0xf0] }
  0xbc   : > { %v633_v22 = vpack.c.b16 %v626_v12, %v625_v57  ;;  %463 = vst [vmem:[#allocation2 + $0x28] sm:$0xf] %v462_v19  ;;  %v543_v24 = vor.u32 %v542_v15, %v539_v14  ;;  %v562_v28 = vrot.slane %v560_v52, 5  ;;  %v2016_v29 = vrot.slane %v765_v13, 9  ;;  %v1996_v1 = vld [vmem:[#allocation2 + $0x20] sm:$0xf] }
  0xbd   : > { %v558_v25 = vrot.slane %v557_v16, 4  ;;  %466 = vst [vmem:[#allocation2 + $0x2c] sm:$0x1] %v465_v20  ;;  %v391_v30 = vshrl.u32 %v347_v21, 16  ;;  %v548_v32 = vrot.slane %v546_v6, 5  ;;  %v800_v33 = vrot.slane %v499_v0, 5 }
  0xbe   : > { %1982 = vmatmul.msk.bf16.vlgmr.msrb.gmra.mxu0 %vm270_vm0, %v633_v22  ;;  %v804_v34 = vrot.slane %v2542_v46, 5  ;;  %v307_v35 = vpop.f32.mrf.mxu3  ;;  %v544_v36 = vrot.slane %v543_v24, 4  ;;  %v565_v38 = vshrl.u32 %v489_v23, 16  ;;  %v568_v39 = vshll.u32 %v489_v23, 16  ;;  %v2225_v46 = vld [vmem:[%s2875_s3 + $0x58] sm:$0xff]  ;;  %v2224_v20 = vld [vmem:[%s2875_s3 + $0x50] sm:$0xff] }
  0xbf   : > { %v563_v37 = vsel %vm2530_vm12, %v558_v25, %v562_v28  ;;  %963 = vmatpush.bf16.msrb.mxu0 %v2221_v18  ;;  %v393_v42 = vrot.slane %v391_v30, 7  ;;  %v394_v43 = vshll.u32 %v347_v21, 16  ;;  %v308_v44 = vadd.f32 %v2484_v11, %v307_v35  ;;  %1303 = vmatpush.bf16.msrb.mxu2 %v2225_v46  ;;  %v1988_v3 = vld [vmem:[#allocation2] sm:$0xf]  ;;  %v501_v6 = vld [vmem:[#allocation2 + $0x24] sm:$0x1] }
  0xc0   : > { %v801_v45 = vsel %vm2510_vm9, %v2016_v29, %v800_v33  ;;  %v549_v49 = vsel %vm2530_vm12, %v544_v36, %v548_v32  ;;  %v628_v50 = vunpack.c.l.b16 %v563_v37  ;;  %v805_v51 = vsel %vm2510_vm9, %v2017_v17, %v804_v34  ;;  %v473_v15 = vld [vmem:[#allocation2 + $0x38] sm:$0xf]  ;;  %v767_v25 = vld [vmem:[#allocation2 + $0x20] sm:$0xe]  ;;  %v476_v28 = vld [vmem:[#allocation2 + $0x3c] sm:$0x1] }
  0xc1   : > { %v829_v52 = vunpack.c.l.b16 %v801_v45  ;;  %v396_v53 = vor.u32 %v394_v43, %v393_v42  ;;  %v397_v54 = vrot.slane %v393_v42, 4  ;;  %v318_v55 = vmax.f32 %v308_v44, 0.0 }
  0xc2   : > { %v627_v56 = vunpack.c.l.b16 %v549_v49  ;;  %v830_v57 = vunpack.c.l.b16 %v805_v51  ;;  %v567_v58 = vrot.slane %v565_v38, 4  ;;  %v570_v59 = vrot.slane %v568_v39, 5  ;;  %v2231_v38 = vld [vmem:[%s2875_s3 + $0x68] sm:$0xff]  ;;  %v2233_v51 = vld [vmem:[%s2875_s3 + $0x78] sm:$0xff] }
  0xc3   : > { %964 = vmatpush.bf16.msrb.mxu0 %v2220_v40  ;;  %v468_v60 = vsel %vm2495_vm5, %v396_v53, %v467_v47  ;;  %v471_v62 = vsel %vm2501_vm6, %v397_v54, %v470_v48  ;;  %v348_v63 = vpack.c.bf16 %v318_v55, %v318_v55  ;;  %v2208_v2 = vld [vmem:[#allocation2 + $0x24] sm:$0xf0]  ;;  %v1989_v29 = vor.u32 %v2206_v4, %v1988_v3  ;;  %v2230_v55 = vld [vmem:[%s2875_s3 + $0x60] sm:$0xff] }
  0xc4   : > { %v634_v0 = vpack.c.b16 %v628_v50, %v627_v56  ;;  %v490_v5 = vld [vmem:[#allocation2 + $0x28] sm:$0xf]  ;;  %469 = vst [vmem:[#allocation2 + $0x30] sm:$0xf] %v468_v60  ;;  %v836_v7 = vpack.c.b16 %v830_v57, %v829_v52  ;;  %v502_v8 = vld [vmem:[#allocation2 + $0x2c] sm:$0x1]  ;;  %v1997_v17 = vor.u32 %v2208_v2, %v1996_v1  ;;  %v571_v18 = vor.u32 %v570_v59, %v567_v58 }
  0xc5   : > { %v768_v9 = vld [vmem:[#allocation2 + $0x28] sm:$0xe]  ;;  %472 = vst [vmem:[#allocation2 + $0x34] sm:$0x1] %v471_v62  ;;  %v399_v10 = vshrl.u32 %v348_v63, 16  ;;  %v402_v12 = vshll.u32 %v348_v63, 16  ;;  %1304 = vmatpush.bf16.msrb.mxu2 %v2224_v20  ;;  %1398 = vmatpush.bf16.msra.mxu3 %v2231_v38 }
  0xc6   : > { %1983 = vmatmul.msk.bf16.vlgmr.msra.gmra.mxu1 %vm270_vm0, %v634_v0  ;;  %v579_v13 = vshrl.u32 %v490_v5, 16  ;;  %v582_v14 = vshll.u32 %v490_v5, 16  ;;  %2035 = vmatmul.msk.bf16.gmra.mxu3 %vm270_vm0, %v836_v7  ;;  %v309_v16 = vpop.f32.mrf.mxu3  ;;  %v588_v19 = vshll.u32 %v502_v8, 16  ;;  %v574_v30 = vshll.u32 %v501_v6, 16  ;;  %v479_v60 = vld [vmem:[#allocation2 + $0x40] sm:$0xf] }
  0xc7   : > { %v401_v21 = vrot.slane %v399_v10, 7  ;;  %v310_v22 = vadd.f32 %v2484_v11, %v309_v16  ;;  %v2019_v32 = vrot.slane %v768_v9, 9  ;;  %v812_v33 = vrot.slane %v502_v8, 5  ;;  %v482_v62 = vld [vmem:[#allocation2 + $0x44] sm:$0x1]  ;;  %1738 = vmatpush.bf16.msra.mxu1 %v2235_v27 }
  0xc8   : > { %v581_v23 = vrot.slane %v579_v13, 4  ;;  %v584_v24 = vrot.slane %v582_v14, 5  ;;  %v572_v11 = vrot.slane %v571_v18, 4  ;;  %v590_v39 = vrot.slane %v588_v19, 5  ;;  %v1000_v27 = vld [vmem:[#allocation2 + $0x20] sm:$0xf] }
  0xc9   : > { %v404_v34 = vor.u32 %v402_v12, %v401_v21  ;;  %v405_v35 = vrot.slane %v401_v21, 4  ;;  %v319_v36 = vmax.f32 %v310_v22, 0.0  ;;  %2012 = vmatmul.msk.bf16.gmra.mxu2 %vm270_vm0, %v1997_v17  ;;  %v2018_v40 = vrot.slane %v767_v25, 9  ;;  %1399 = vmatpush.bf16.msra.mxu3 %v2230_v55  ;;  %v2044_v25 = vld [vmem:[#allocation2 + $0x8] sm:$0xf] }
  0xca   : > { %v585_v37 = vor.u32 %v584_v24, %v581_v23  ;;  %v808_v41 = vrot.slane %v501_v6, 5  ;;  %v576_v47 = vrot.slane %v574_v30, 5  ;;  %v813_v50 = vsel %vm2510_vm9, %v2019_v32, %v812_v33  ;;  %v2216_v23 = vld [vmem:[#allocation2 + $0xc] sm:$0xf0] }
  0xcb   : > { %v474_v42 = vsel %vm2495_vm5, %v404_v34, %v473_v15  ;;  %v477_v43 = vsel %vm2501_vm6, %v405_v35, %v476_v28  ;;  %v349_v44 = vpack.c.bf16 %v319_v36, %v319_v36  ;;  %v491_v46 = vld [vmem:[#allocation2 + $0x30] sm:$0xf]  ;;  %v832_v63 = vunpack.c.l.b16 %v813_v50  ;;  %v995_v34 = vld [vmem:[#allocation2 + $0xc] sm:$0x1]  ;;  %v997_v35 = vld [vmem:[#allocation2 + $0x14] sm:$0x1] }
  0xcc   : > { %v586_v45 = vrot.slane %v585_v37, 4  ;;  %475 = vst [vmem:[#allocation2 + $0x38] sm:$0xf] %v474_v42  ;;  %v577_v52 = vsel %vm2530_vm12, %v572_v11, %v576_v47  ;;  %v593_v53 = vshrl.u32 %v491_v46, 16  ;;  %v596_v54 = vshll.u32 %v491_v46, 16 }
  0xcd   : > { %478 = vst [vmem:[#allocation2 + $0x3c] sm:$0x1] %v477_v43  ;;  %v407_v48 = vshrl.u32 %v349_v44, 16  ;;  %v410_v57 = vshll.u32 %v349_v44, 16  ;;  %v809_v59 = vsel %vm2510_vm9, %v2018_v40, %v808_v41  ;;  %v629_v2 = vunpack.c.l.b16 %v577_v52  ;;  %v503_v10 = vld [vmem:[#allocation2 + $0x34] sm:$0x1] }
  0xce   : > { %2010 = vmatmul.msk.bf16.vlgmr.msra.gmra.mxu0 %vm270_vm0, %v1989_v29  ;;  %v591_v49 = vsel %vm2530_vm12, %v586_v45, %v590_v39  ;;  %v831_v3 = vunpack.c.l.b16 %v809_v59  ;;  %v595_v4 = vrot.slane %v593_v53, 4  ;;  %v598_v5 = vrot.slane %v596_v54, 5  ;;  %v2000_v13 = vld [vmem:[#allocation2 + $0x30] sm:$0xf]  ;;  %v1200_v40 = vld [vmem:[#allocation2 + $0x8] sm:$0xe] }
  0xcf   : > { %v409_v56 = vrot.slane %v407_v48, 7  ;;  %v630_v58 = vunpack.c.l.b16 %v591_v49  ;;  %1604 = vmatpush.bf16.msra.mxu0 %v2233_v51  ;;  %v602_v24 = vshll.u32 %v503_v10, 16  ;;  %v769_v29 = vld [vmem:[#allocation2 + $0x30] sm:$0xe]  ;;  %v2045_v37 = vor.u32 %v2216_v23, %v2044_v25  ;;  %v994_v45 = vld [vmem:[#allocation2 + $0x8] sm:$0xf] }
  0xd0   : > { %v837_v12 = vpack.c.b16 %v832_v63, %v831_v3  ;;  %v599_v31 = vor.u32 %v598_v5, %v595_v4  ;;  %v1201_v30 = vld [vmem:[#allocation2 + $0x10] sm:$0xe]  ;;  %v2020_v42 = vrot.slane %v769_v29, 9  ;;  %v816_v43 = vrot.slane %v503_v10, 5  ;;  %v999_v23 = vld [vmem:[#allocation2 + $0x1c] sm:$0x1] }
  0xd1   : > { %v412_v0 = vor.u32 %v410_v57, %v409_v56  ;;  %v413_v1 = vrot.slane %v409_v56, 4  ;;  %v635_v8 = vpack.c.b16 %v630_v58, %v629_v2  ;;  %v996_v36 = vld [vmem:[#allocation2 + $0x10] sm:$0xf]  ;;  %v604_v41 = vrot.slane %v602_v24, 5  ;;  %v998_v25 = vld [vmem:[#allocation2 + $0x18] sm:$0xf] }
  0xd2   : > { %v600_v38 = vrot.slane %v599_v31, 4  ;;  %v2087_v44 = vrot.slane %v1201_v30, 9  ;;  %v1230_v47 = vrot.slane %v997_v35, 5  ;;  %v1025_v48 = vshrl.u32 %v996_v36, 16  ;;  %v2048_v31 = vld [vmem:[#allocation2 + $0x18] sm:$0xf] }
  0xd3   : > { %v480_v6 = vsel %vm2495_vm5, %v412_v0, %v479_v60  ;;  %v483_v7 = vsel %vm2501_vm6, %v413_v1, %v482_v62  ;;  %v492_v9 = vld [vmem:[#allocation2 + $0x38] sm:$0xf]  ;;  %v1028_v49 = vshll.u32 %v996_v36, 16  ;;  %v2086_v51 = vrot.slane %v1200_v40, 9 }
  0xd4   : > { %481 = vst [vmem:[#allocation2 + $0x40] sm:$0xf] %v480_v6  ;;  %v2209_v14 = vld [vmem:[#allocation2 + $0x34] sm:$0xf0]  ;;  %v607_v15 = vshrl.u32 %v492_v9, 16  ;;  %v610_v16 = vshll.u32 %v492_v9, 16  ;;  %v605_v52 = vsel %vm2530_vm12, %v600_v38, %v604_v41  ;;  %v817_v57 = vsel %vm2510_vm9, %v2020_v42, %v816_v43 }
  0xd5   : > { %484 = vst [vmem:[#allocation2 + $0x44] sm:$0x1] %v483_v7  ;;  %v504_v17 = vld [vmem:[#allocation2 + $0x3c] sm:$0x1]  ;;  %v770_v21 = vld [vmem:[#allocation2 + $0x38] sm:$0xe]  ;;  %v2001_v22 = vor.u32 %v2209_v14, %v2000_v13  ;;  %v1231_v59 = vsel %vm2510_vm9, %v2087_v44, %v1230_v47  ;;  %v631_v63 = vunpack.c.l.b16 %v605_v52  ;;  %v833_v0 = vunpack.c.l.b16 %v817_v57 }
  0xd6   : > { %1984 = vmatmul.msk.bf16.gmra.mxu1 %vm270_vm0, %v635_v8  ;;  %2036 = vmatmul.msk.bf16.gmra.mxu3 %vm270_vm0, %v837_v12  ;;  %v609_v18 = vrot.slane %v607_v15, 4  ;;  %v612_v19 = vrot.slane %v610_v16, 5  ;;  %v616_v20 = vshll.u32 %v504_v17, 16  ;;  %v2021_v32 = vrot.slane %v770_v21, 9  ;;  %v2217_v14 = vld [vmem:[#allocation2 + $0x1c] sm:$0xf0] }
  0xd7   : > { %v820_v33 = vrot.slane %v504_v17, 5  ;;  %v1226_v53 = vrot.slane %v995_v34, 5  ;;  %v1011_v54 = vshrl.u32 %v994_v45, 16  ;;  %v1014_v55 = vshll.u32 %v994_v45, 16  ;;  %v1203_v16 = vld [vmem:[#allocation2 + $0x20] sm:$0xe] }
  0xd8   : > { %v613_v28 = vor.u32 %v612_v19, %v609_v18  ;;  %v618_v39 = vrot.slane %v616_v20, 5  ;;  %v1027_v60 = vrot.slane %v1025_v48, 4  ;;  %v1030_v62 = vrot.slane %v1028_v49, 5  ;;  %v1001_v17 = vld [vmem:[#allocation2 + $0x24] sm:$0x1] }
  0xd9   : > { %2013 = vmatmul.msk.bf16.gmra.mxu2 %vm270_vm0, %v2001_v22  ;;  %v821_v50 = vsel %vm2510_vm9, %v2021_v32, %v820_v33  ;;  %v1227_v1 = vsel %vm2510_vm9, %v2086_v51, %v1226_v53  ;;  %v1013_v2 = vrot.slane %v1011_v54, 4  ;;  %v1016_v3 = vrot.slane %v1014_v55, 5  ;;  %v1202_v20 = vld [vmem:[#allocation2 + $0x18] sm:$0xe]  ;;  %v2116_v43 = vld [vmem:[#allocation2 + $0x10] sm:$0xf] }
  0xda   : > { %v614_v11 = vrot.slane %v613_v28, 4  ;;  %v834_v58 = vunpack.c.l.b16 %v821_v50  ;;  %v1262_v5 = vunpack.c.l.b16 %v1231_v59  ;;  %v1031_v7 = vor.u32 %v1030_v62, %v1027_v60  ;;  %v2226_v48 = vld [vmem:[#allocation2 + $0x14] sm:$0xf0]  ;;  %v2234_v53 = vld [vmem:[%s2875_s3 + $0x80] sm:$0xff]  ;;  %v1205_v60 = vld [vmem:[#allocation2 + $0x30] sm:$0xe] }
  0xdb   : > { %v1261_v8 = vunpack.c.l.b16 %v1227_v1  ;;  %v1017_v9 = vor.u32 %v1016_v3, %v1013_v2  ;;  %v1034_v10 = vshll.u32 %v997_v35, 16  ;;  %v1020_v13 = vshll.u32 %v995_v34, 16  ;;  %v2232_v34 = vld [vmem:[%s2875_s3 + $0x70] sm:$0xff]  ;;  %1739 = vmatpush.bf16.msra.mxu1 %v2234_v53  ;;  %v1002_v3 = vld [vmem:[#allocation2 + $0x28] sm:$0xf] }
  0xdc   : > { %v619_v46 = vsel %vm2530_vm12, %v614_v11, %v618_v39  ;;  %v838_v6 = vpack.c.b16 %v834_v58, %v833_v0  ;;  %v1032_v15 = vrot.slane %v1031_v7, 4  ;;  %v2049_v21 = vor.u32 %v2217_v14, %v2048_v31  ;;  %1605 = vmatpush.bf16.msra.mxu0 %v2232_v34  ;;  %v2218_v58 = vld [vmem:[#allocation2 + $0x2c] sm:$0xf0]  ;;  %v1005_v62 = vld [vmem:[#allocation2 + $0x34] sm:$0x1] }
  0xdd   : > { %v632_v56 = vunpack.c.l.b16 %v619_v46  ;;  %v1269_v12 = vpack.c.b16 %v1262_v5, %v1261_v8  ;;  %v1018_v18 = vrot.slane %v1017_v9, 4  ;;  %v1036_v19 = vrot.slane %v1034_v10, 5  ;;  %v2052_v0 = vld [vmem:[#allocation2 + $0x28] sm:$0xf]  ;;  %v2670_v53 = vld [vmem:[#allocation2 + $0x14] sm:$0x1] }
  0xde   : > { %2066 = vmatmul.msk.bf16.vlgmr.msrb.gmra.mxu0 %vm270_vm0, %v2045_v37  ;;  %v1022_v22 = vrot.slane %v1020_v13, 5  ;;  %v2089_v24 = vrot.slane %v1203_v16, 9  ;;  %v1238_v29 = vrot.slane %v1001_v17, 5  ;;  %v1053_v30 = vshrl.u32 %v1000_v27, 16  ;;  %v1204_v7 = vld [vmem:[#allocation2 + $0x28] sm:$0xe] }
  0xdf   : > { %v636_v4 = vpack.c.b16 %v632_v56, %v631_v63  ;;  %v1037_v28 = vsel %vm2530_vm12, %v1032_v15, %v1036_v19  ;;  %v1056_v32 = vshll.u32 %v1000_v27, 16  ;;  %v2088_v33 = vrot.slane %v1202_v20, 9  ;;  %v1004_v63 = vld [vmem:[#allocation2 + $0x30] sm:$0xf] }
  0xe0   : > { %v1023_v35 = vsel %vm2530_vm12, %v1018_v18, %v1022_v22  ;;  %v1234_v36 = vrot.slane %v999_v23, 5  ;;  %v1039_v37 = vshrl.u32 %v998_v25, 16  ;;  %v1042_v38 = vshll.u32 %v998_v25, 16  ;;  %v2227_v22 = vld [vmem:[#allocation2 + $0x24] sm:$0xf0] }
  0xe1   : > { %v1128_v11 = vunpack.c.l.b16 %v1037_v28  ;;  %v1239_v39 = vsel %vm2510_vm9, %v2089_v24, %v1238_v29  ;;  %v1055_v40 = vrot.slane %v1053_v30, 4  ;;  %v1058_v41 = vrot.slane %v1056_v32, 5  ;;  %v1429_v25 = vld [vmem:[#allocation2 + $0x10] sm:$0xf]  ;;  %v2120_v30 = vld [vmem:[#allocation2 + $0x20] sm:$0xf] }
  0xe2   : > { %v1127_v42 = vunpack.c.l.b16 %v1023_v35  ;;  %v1235_v44 = vsel %vm2510_vm9, %v2088_v33, %v1234_v36  ;;  %v1041_v45 = vrot.slane %v1039_v37, 4  ;;  %v1044_v46 = vrot.slane %v1042_v38, 5  ;;  %v1431_v33 = vld [vmem:[#allocation2 + $0x18] sm:$0xf] }
  0xe3   : > { %v1264_v49 = vunpack.c.l.b16 %v1239_v39  ;;  %v2117_v50 = vor.u32 %v2226_v48, %v2116_v43  ;;  %v1059_v51 = vor.u32 %v1058_v41, %v1055_v40  ;;  %v1263_v52 = vunpack.c.l.b16 %v1235_v44  ;;  %v2219_v43 = vld [vmem:[#allocation2 + $0x3c] sm:$0xf0] }
  0xe4   : > { %v1135_v47 = vpack.c.b16 %v1128_v11, %v1127_v42  ;;  %v1045_v54 = vor.u32 %v1044_v46, %v1041_v45  ;;  %v1062_v55 = vshll.u32 %v1001_v17, 16  ;;  %v1048_v57 = vshll.u32 %v999_v23, 16  ;;  %v2665_v45 = vld [vmem:[#allocation2 + $0x44] sm:$0x1]  ;;  %v2056_v46 = vld [vmem:[#allocation2 + $0x38] sm:$0xf] }
  0xe5   : > { %v1270_v56 = vpack.c.b16 %v1264_v49, %v1263_v52  ;;  %v1060_v59 = vrot.slane %v1059_v51, 4  ;;  %v2091_v8 = vrot.slane %v1205_v60, 9  ;;  %v1246_v10 = vrot.slane %v1005_v62, 5  ;;  %v1207_v48 = vld [vmem:[#allocation2 + $0x40] sm:$0xe] }
  0xe6   : > { %1985 = vmatmul.msk.bf16.gmra.mxu1 %vm270_vm0, %v636_v4  ;;  %2037 = vmatmul.msk.bf16.gmra.mxu3 %vm270_vm0, %v838_v6  ;;  %v1046_v1 = vrot.slane %v1045_v54, 4  ;;  %v1064_v2 = vrot.slane %v1062_v55, 5  ;;  %v2053_v4 = vor.u32 %v2218_v58, %v2052_v0  ;;  %v1050_v5 = vrot.slane %v1048_v57, 5  ;;  %v1003_v6 = vld [vmem:[#allocation2 + $0x2c] sm:$0x1] }
  0xe7   : > { %v1084_v13 = vshll.u32 %v1004_v63, 16  ;;  %v1067_v14 = vshrl.u32 %v1002_v3, 16  ;;  %v1070_v15 = vshll.u32 %v1002_v3, 16  ;;  %v2090_v17 = vrot.slane %v1204_v7, 9  ;;  %v2668_v52 = vld [vmem:[#allocation2 + $0x3c] sm:$0x1] }
  0xe8   : > { %v1065_v9 = vsel %vm2530_vm12, %v1060_v59, %v1064_v2  ;;  %v1051_v16 = vsel %vm2530_vm12, %v1046_v1, %v1050_v5  ;;  %v1242_v27 = vrot.slane %v1003_v6, 5  ;;  %v1247_v18 = vsel %vm2510_vm9, %v2091_v8, %v1246_v10  ;;  %v1008_v54 = vld [vmem:[#allocation2 + $0x40] sm:$0xf]  ;;  %v1006_v0 = vld [vmem:[#allocation2 + $0x38] sm:$0xf] }
  0xe9   : > { %2106 = vmatmul.msk.bf16.vlgmr.msrb.gmra.mxu2 %vm270_vm0, %v1269_v12  ;;  %v1081_v12 = vshrl.u32 %v1004_v63, 16  ;;  %v1130_v31 = vunpack.c.l.b16 %v1065_v9  ;;  %v1086_v20 = vrot.slane %v1084_v13, 5  ;;  %v1069_v23 = vrot.slane %v1067_v14, 4  ;;  %v2679_v8 = vld [vmem:[#allocation2 + $0x1c] sm:$0x1] }
  0xea   : > { %v1072_v24 = vrot.slane %v1070_v15, 5  ;;  %v1243_v28 = vsel %vm2510_vm9, %v2090_v17, %v1242_v27  ;;  %v1266_v32 = vunpack.c.l.b16 %v1247_v18  ;;  %v2121_v34 = vor.u32 %v2227_v22, %v2120_v30  ;;  %v1435_v22 = vld [vmem:[#allocation2 + $0x28] sm:$0xf] }
  0xeb   : > { %v1083_v19 = vrot.slane %v1081_v12, 4  ;;  %v1446_v36 = vshrl.u32 %v1429_v25, 16  ;;  %v1449_v37 = vshll.u32 %v1429_v25, 16  ;;  %v1265_v38 = vunpack.c.l.b16 %v1243_v28 }
  0xec   : > { %v1073_v11 = vor.u32 %v1072_v24, %v1069_v23  ;;  %v1090_v39 = vshll.u32 %v1005_v62, 16  ;;  %v1460_v40 = vshrl.u32 %v1431_v33, 16  ;;  %v1463_v41 = vshll.u32 %v1431_v33, 16 }
  0xed   : > { %v1087_v35 = vor.u32 %v1086_v20, %v1083_v19  ;;  %v1271_v42 = vpack.c.b16 %v1266_v32, %v1265_v38  ;;  %v1076_v44 = vshll.u32 %v1003_v6, 16  ;;  %v1448_v49 = vrot.slane %v1446_v36, 4  ;;  %v2124_v20 = vld [vmem:[#allocation2 + $0x30] sm:$0xf] }
  0xee   : > { %2067 = vmatmul.msk.bf16.gmra.mxu0 %vm270_vm0, %v2049_v21  ;;  %v1129_v21 = vunpack.c.l.b16 %v1051_v16  ;;  %v1074_v51 = vrot.slane %v1073_v11, 4  ;;  %v1092_v55 = vrot.slane %v1090_v39, 5  ;;  %v1462_v57 = vrot.slane %v1460_v40, 4  ;;  %v2228_v16 = vld [vmem:[#allocation2 + $0x34] sm:$0xf0] }
  0xef   : > { %v1465_v58 = vrot.slane %v1463_v41, 5  ;;  %v2057_v59 = vor.u32 %v2219_v43, %v2056_v46  ;;  %v1078_v60 = vrot.slane %v1076_v44, 5  ;;  %v2093_v62 = vrot.slane %v1207_v48, 9 }
  0xf0   : > { %v1136_v29 = vpack.c.b16 %v1130_v31, %v1129_v21  ;;  %v1254_v63 = vrot.slane %v2665_v45, 5  ;;  %v1109_v3 = vshrl.u32 %v1008_v54, 16  ;;  %v1250_v7 = vrot.slane %v2668_v52, 5 }
  0xf1   : > { %v1079_v5 = vsel %vm2530_vm12, %v1074_v51, %v1078_v60  ;;  %v1455_v9 = vshll.u32 %v2670_v53, 16  ;;  %v1466_v10 = vor.u32 %v1465_v58, %v1462_v57  ;;  %v1095_v12 = vshrl.u32 %v1006_v0, 16 }
  0xf2   : > { %v1098_v13 = vshll.u32 %v1006_v0, 16  ;;  %v1469_v15 = vshll.u32 %v2679_v8, 16  ;;  %v1255_v17 = vsel %vm2510_vm9, %v2093_v62, %v1254_v63  ;;  %v1111_v31 = vrot.slane %v1109_v3, 4  ;;  %v2699_v62 = vld [vmem:[#allocation2 + $0x24] sm:$0x1] }
  0xf3   : > { %v1131_v19 = vunpack.c.l.b16 %v1079_v5  ;;  %v1457_v23 = vrot.slane %v1455_v9, 5  ;;  %v1467_v24 = vrot.slane %v1466_v10, 4  ;;  %v1097_v25 = vrot.slane %v1095_v12, 4  ;;  %v2128_v3 = vld [vmem:[#allocation2 + $0x40] sm:$0xf] }
  0xf4   : > { %v1100_v28 = vrot.slane %v1098_v13, 5  ;;  %v2125_v32 = vor.u32 %v2228_v16, %v2124_v20  ;;  %v1268_v33 = vunpack.c.l.b16 %v1255_v17  ;;  %v1491_v38 = vshll.u32 %v1435_v22, 16  ;;  %v1439_v9 = vld [vmem:[#allocation2 + $0x38] sm:$0xf] }
  0xf5   : > { %v1483_v5 = vshll.u32 %v2699_v62, 16 }
  0xf6   : > { %2082 = vmatmul.msk.bf16.vlgmr.msrb.gmra.mxu1 %vm270_vm0, %v1135_v47  ;;  %2138 = vmatmul.msk.bf16.vlgmr.msra.gmra.mxu3 %vm270_vm0, %v2117_v50  ;;  %v1088_v47 = vrot.slane %v1087_v35, 4  ;;  %v1451_v50 = vrot.slane %v1449_v37, 5  ;;  %v1488_v37 = vshrl.u32 %v1435_v22, 16  ;;  %v1101_v41 = vor.u32 %v1100_v28, %v1097_v25 }
  0xf7   : > { %v1485_v16 = vrot.slane %v1483_v5, 5  ;;  %v1661_v25 = vrot.slane %v2670_v53, 5 }
  0xf8   : > { %v1093_v1 = vsel %vm2530_vm12, %v1088_v47, %v1092_v55  ;;  %v1452_v2 = vor.u32 %v1451_v50, %v1448_v49  ;;  %v1104_v47 = vshll.u32 %v2668_v52, 16  ;;  %v1490_v49 = vrot.slane %v1488_v37, 4  ;;  %v2701_v52 = vld [vmem:[#allocation2 + $0x2c] sm:$0x1] }
  0xf9   : > { %2107 = vmatmul.msk.bf16.gmra.mxu2 %vm270_vm0, %v1270_v56  ;;  %v1206_v56 = vld [vmem:[#allocation2 + $0x38] sm:$0xe]  ;;  %v1132_v14 = vunpack.c.l.b16 %v1093_v1  ;;  %v1493_v50 = vrot.slane %v1491_v38, 5  ;;  %v1497_v1 = vshll.u32 %v2701_v52, 16  ;;  %v2717_v38 = vld [vmem:[#allocation2 + $0x34] sm:$0x1] }
  0xfa   : > { %v2092_v6 = vrot.slane %v1206_v56, 9  ;;  %v1453_v27 = vrot.slane %v1452_v2, 4 }
  0xfb   : > { %v1137_v30 = vpack.c.b16 %v1132_v14, %v1131_v19  ;;  %v1494_v60 = vor.u32 %v1493_v50, %v1490_v49  ;;  %v1499_v12 = vrot.slane %v1497_v1, 5  ;;  %v1673_v1 = vrot.slane %v2701_v52, 5 }
  0xfc   : > { %v1251_v21 = vsel %vm2510_vm9, %v2092_v6, %v1250_v7  ;;  %v1458_v35 = vsel %vm2530_vm12, %v1453_v27, %v1457_v23  ;;  %v1516_v27 = vshrl.u32 %v1439_v9, 16  ;;  %v1636_v23 = vld [vmem:[#allocation2 + $0x18] sm:$0xe] }
  0xfd   : > { %v1267_v11 = vunpack.c.l.b16 %v1251_v21  ;;  %v1562_v46 = vunpack.c.l.b16 %v1458_v35  ;;  %v1495_v6 = vrot.slane %v1494_v60, 4 }
  0xfe   : > { %2068 = vmatmul.msk.bf16.gmra.mxu0 %vm270_vm0, %v2053_v4  ;;  %v1112_v4 = vshll.u32 %v1008_v54, 16  ;;  %v1102_v54 = vrot.slane %v1101_v41, 4  ;;  %v1518_v28 = vrot.slane %v1516_v27, 4 }
  0xff   : > { %v1272_v44 = vpack.c.b16 %v1268_v33, %v1267_v11  ;;  %v1500_v17 = vsel %vm2530_vm12, %v1495_v6, %v1499_v12  ;;  %v1665_v33 = vrot.slane %v2679_v8, 5  ;;  %v1669_v12 = vrot.slane %v2699_v62, 5 }
 0x100   : > { %v1114_v18 = vrot.slane %v1112_v4, 5  ;;  %v2229_v4 = vld [vmem:[#allocation2 + $0x44] sm:$0xf0]  ;;  %v1565_v22 = vunpack.c.l.b16 %v1500_v17 }
 0x101   : > { %v2129_v14 = vor.u32 %v2229_v4, %v2128_v3 }
 0x102   : > { %v1115_v36 = vor.u32 %v1114_v18, %v1111_v31  ;;  %v1519_v31 = vshll.u32 %v1439_v9, 16  ;;  %v1635_v18 = vld [vmem:[#allocation2 + $0x10] sm:$0xe] }
 0x104   : > { %v1116_v48 = vrot.slane %v1115_v36, 4 }
 0x106   : > { %2083 = vmatmul.msk.bf16.gmra.mxu1 %vm270_vm0, %v1136_v29  ;;  %2139 = vmatmul.msk.bf16.gmra.mxu3 %vm270_vm0, %v2121_v34  ;;  %v1433_v29 = vld [vmem:[#allocation2 + $0x20] sm:$0xf]  ;;  %v1471_v34 = vrot.slane %v1469_v15, 5  ;;  %v1437_v15 = vld [vmem:[#allocation2 + $0x30] sm:$0xf] }
 0x107   : > { %v1474_v39 = vshrl.u32 %v1433_v29, 16  ;;  %v1477_v43 = vshll.u32 %v1433_v29, 16  ;;  %v1502_v20 = vshrl.u32 %v1437_v15, 16  ;;  %v1505_v21 = vshll.u32 %v1437_v15, 16  ;;  %v2735_v15 = vld [vmem:[#allocation2 + $0x4c] sm:$0x1] }
 0x108   : > { %v1472_v40 = vsel %vm2530_vm12, %v1467_v24, %v1471_v34  ;;  %v2158_v24 = vrot.slane %v1635_v18, 9  ;;  %v1521_v29 = vrot.slane %v1519_v31, 5  ;;  %v1553_v31 = vshll.u32 %v2735_v15, 16 }
 0x109   : > { %2108 = vmatmul.msk.bf16.gmra.mxu2 %vm270_vm0, %v1271_v42  ;;  %v1118_v42 = vshll.u32 %v2665_v45, 16  ;;  %v1563_v51 = vunpack.c.l.b16 %v1472_v40  ;;  %v1476_v56 = vrot.slane %v1474_v39, 4  ;;  %v1479_v57 = vrot.slane %v1477_v43, 5  ;;  %v2720_v39 = vld [vmem:[#allocation2 + $0x3c] sm:$0x1] }
 0x10a   : > { %v1504_v34 = vrot.slane %v1502_v20, 4  ;;  %v1507_v35 = vrot.slane %v1505_v21, 5  ;;  %v1662_v37 = vsel %vm2510_vm9, %v2158_v24, %v1661_v25  ;;  %v1522_v11 = vor.u32 %v1521_v29, %v1518_v28 }
 0x10b   : > { %v1120_v55 = vrot.slane %v1118_v42, 5  ;;  %v1570_v58 = vpack.c.b16 %v1563_v51, %v1562_v46  ;;  %v1480_v0 = vor.u32 %v1479_v57, %v1476_v56  ;;  %v1525_v41 = vshll.u32 %v2720_v39, 16  ;;  %v1638_v56 = vld [vmem:[#allocation2 + $0x28] sm:$0xe] }
 0x10c   : > { %v1508_v40 = vor.u32 %v1507_v35, %v1504_v34  ;;  %v1696_v8 = vunpack.c.l.b16 %v1662_v37  ;;  %v1511_v42 = vshll.u32 %v2717_v38, 16  ;;  %v1523_v43 = vrot.slane %v1522_v11, 4 }
 0x10d   : > { %v1121_v45 = vsel %vm2530_vm12, %v1116_v48, %v1120_v55  ;;  %v1481_v10 = vrot.slane %v1480_v0, 4  ;;  %v1527_v49 = vrot.slane %v1525_v41, 5  ;;  %v2161_v0 = vrot.slane %v1638_v56, 9 }
 0x10e   : > { %2069 = vmatmul.msk.bf16.gmra.mxu0 %vm270_vm0, %v2057_v59  ;;  %v1106_v59 = vrot.slane %v1104_v47, 5  ;;  %v1134_v2 = vunpack.c.l.b16 %v1121_v45  ;;  %v1443_v47 = vld [vmem:[#allocation2 + $0x48] sm:$0xf]  ;;  %v1509_v48 = vrot.slane %v1508_v40, 4  ;;  %v1513_v51 = vrot.slane %v1511_v42, 5 }
 0x10f   : > { %v1486_v19 = vsel %vm2530_vm12, %v1481_v10, %v1485_v16  ;;  %v1528_v55 = vsel %vm2530_vm12, %v1523_v43, %v1527_v49  ;;  %v1674_v17 = vsel %vm2510_vm9, %v2161_v0, %v1673_v1  ;;  %v1681_v41 = vrot.slane %v2720_v39, 5 }
 0x110   : > { %v1107_v63 = vsel %vm2530_vm12, %v1102_v54, %v1106_v59  ;;  %v1547_v59 = vshll.u32 %v1443_v47, 16  ;;  %v1514_v45 = vsel %vm2530_vm12, %v1509_v48, %v1513_v51  ;;  %v1567_v60 = vunpack.c.l.b16 %v1528_v55 }
 0x111   : > { %v1133_v7 = vunpack.c.l.b16 %v1107_v63  ;;  %v1637_v63 = vld [vmem:[#allocation2 + $0x20] sm:$0xe] }
 0x112   : > { %v1549_v5 = vrot.slane %v1547_v59, 5  ;;  %v2160_v10 = vrot.slane %v1637_v63, 9  ;;  %v1642_v63 = vld [vmem:[#allocation2 + $0x48] sm:$0xe] }
 0x113   : > { %v1138_v13 = vpack.c.b16 %v1134_v2, %v1133_v7  ;;  %v1566_v7 = vunpack.c.l.b16 %v1514_v45 }
 0x114   : > { %v1670_v18 = vsel %vm2510_vm9, %v2160_v10, %v1669_v12 }
 0x115   : > { %v1698_v24 = vunpack.c.l.b16 %v1670_v18 }
 0x116   : > { %2084 = vmatmul.msk.bf16.gmra.mxu1 %vm270_vm0, %v1137_v30  ;;  %2140 = vmatmul.msk.bf16.gmra.mxu3 %vm270_vm0, %v2125_v32  ;;  %v1564_v30 = vunpack.c.l.b16 %v1486_v19  ;;  %v2159_v32 = vrot.slane %v1636_v23, 9  ;;  %v1699_v19 = vunpack.c.l.b16 %v1674_v17 }
 0x118   : > { %v1571_v36 = vpack.c.b16 %v1565_v22, %v1564_v30  ;;  %v1666_v53 = vsel %vm2510_vm9, %v2159_v32, %v1665_v33  ;;  %v1555_v22 = vrot.slane %v1553_v31, 5  ;;  %v1705_v32 = vpack.c.b16 %v1699_v19, %v1698_v24 }
 0x119   : > { %2109 = vmatmul.msk.bf16.gmra.mxu2 %vm270_vm0, %v1272_v44  ;;  %v1441_v44 = vld [vmem:[#allocation2 + $0x40] sm:$0xf]  ;;  %v1697_v46 = vunpack.c.l.b16 %v1666_v53  ;;  %v1639_v53 = vld [vmem:[#allocation2 + $0x30] sm:$0xe] }
 0x11a   : > { %v1530_v54 = vshrl.u32 %v1441_v44, 16  ;;  %v1533_v57 = vshll.u32 %v1441_v44, 16 }
 0x11b   : > { %v1704_v50 = vpack.c.b16 %v1697_v46, %v1696_v8  ;;  %v2162_v46 = vrot.slane %v1639_v53, 9 }
 0x11c   : > { %v1532_v2 = vrot.slane %v1530_v54, 4  ;;  %v1535_v3 = vrot.slane %v1533_v57, 5 }
 0x11e   : > { %2154 = vmatmul.msk.bf16.vlgmr.msra.gmra.mxu0 %vm270_vm0, %v1570_v58  ;;  %v1544_v58 = vshrl.u32 %v1443_v47, 16  ;;  %v1536_v52 = vor.u32 %v1535_v3, %v1532_v2  ;;  %v1677_v47 = vrot.slane %v2717_v38, 5  ;;  %v2165_v3 = vrot.slane %v1642_v63, 9 }
 0x120   : > { %v1546_v4 = vrot.slane %v1544_v58, 4  ;;  %v1537_v20 = vrot.slane %v1536_v52, 4  ;;  %v1678_v39 = vsel %vm2510_vm9, %v2162_v46, %v1677_v47 }
 0x121   : > { %v1700_v56 = vunpack.c.l.b16 %v1678_v39 }
 0x122   : > { %v1550_v27 = vor.u32 %v1549_v5, %v1546_v4  ;;  %v1689_v4 = vrot.slane %v2735_v15, 5 }
 0x124   : > { %v1551_v21 = vrot.slane %v1550_v27, 4 }
 0x126   : > { %2085 = vmatmul.msk.bf16.gmra.mxu1 %vm270_vm0, %v1138_v13  ;;  %2141 = vmatmul.msk.bf16.gmra.mxu3 %vm270_vm0, %v2129_v14  ;;  %v1572_v13 = vpack.c.b16 %v1567_v60, %v1566_v7  ;;  %v2733_v14 = vld [vmem:[#allocation2 + $0x44] sm:$0x1]  ;;  %v1556_v35 = vsel %vm2530_vm12, %v1551_v21, %v1555_v22  ;;  %v1641_v60 = vld [vmem:[#allocation2 + $0x40] sm:$0xe] }
 0x127   : > { %v1539_v62 = vshll.u32 %v2733_v14, 16  ;;  %v1569_v11 = vunpack.c.l.b16 %v1556_v35  ;;  %v2164_v1 = vrot.slane %v1641_v60, 9  ;;  %v1685_v2 = vrot.slane %v2733_v14, 5 }
 0x129   : > { %v1541_v29 = vrot.slane %v1539_v62, 5  ;;  %v1686_v12 = vsel %vm2510_vm9, %v2164_v1, %v1685_v2  ;;  %v2237_v62 = vld [vmem:[%s2876_s4 + $0x8] sm:$0xff] }
 0x12a   : > { %1825 = vmatpush.bf16.msra.mxu2 %v2237_v62 }
 0x12b   : > { %v1542_v34 = vsel %vm2530_vm12, %v1537_v20, %v1541_v29 }
 0x12c   : > { %v1568_v37 = vunpack.c.l.b16 %v1542_v34 }
 0x12e   : > { %2155 = vmatmul.msk.bf16.gmra.mxu0 %vm270_vm0, %v1571_v36  ;;  %v1640_v36 = vld [vmem:[#allocation2 + $0x38] sm:$0xe]  ;;  %v1573_v26 = vpack.c.b16 %v1569_v11, %v1568_v37  ;;  %v2236_v37 = vld [vmem:[%s2876_s4] sm:$0xff] }
 0x12f   : > { %v2163_v40 = vrot.slane %v1640_v36, 9  ;;  %1826 = vmatpush.bf16.msra.mxu2 %v2236_v37 }
 0x131   : > { %v1682_v49 = vsel %vm2510_vm9, %v2163_v40, %v1681_v41 }
 0x132   : > { %v1701_v54 = vunpack.c.l.b16 %v1682_v49 }
 0x134   : > { %v1706_v45 = vpack.c.b16 %v1701_v54, %v1700_v56 }
 0x136   : > { %2178 = vmatmul.msk.bf16.vlgmr.msra.gmra.mxu1 %vm270_vm0, %v1704_v50 }
 0x139   : > { %v872_v6 = vpop.f32.mrf.mxu3 }
 0x13b   : > { %v670_v9 = vpop.f32.mrf.mxu0 }
 0x13c   : > { %v748_v16 = vpop.f32.mrf.mxu2 }
 0x13e   : > { %2156 = vmatmul.msk.bf16.gmra.mxu0 %vm270_vm0, %v1572_v13  ;;  %v1690_v13 = vsel %vm2510_vm9, %v2165_v3, %v1689_v4 }
 0x13f   : > { %v1703_v17 = vunpack.c.l.b16 %v1690_v13 }
 0x141   : > { %v2744_v23 = vpop.f32.mrf.mxu3 }
 0x143   : > { %v672_v25 = vpop.f32.mrf.mxu0  ;;  %v675_v28 = vpop.f32.mrf.mxu1 }
 0x144   : > { %v749_v30 = vadd.f32 %v748_v16, %v675_v28  ;;  %v2746_v33 = vpop.f32.mrf.mxu2  ;;  %v1702_v16 = vunpack.c.l.b16 %v1686_v12  ;;  %v2804_v12 = vld [vmem:[%s2874_s2 + $0x1] ss:$0 sm:$0xff] }
 0x146   : > { %2179 = vmatmul.msk.bf16.gmra.mxu1 %vm270_vm0, %v1705_v32  ;;  %v1707_v18 = vpack.c.b16 %v1703_v17, %v1702_v16 }
 0x149   : > { %v877_v8 = vpop.f32.mrf.mxu3 }
 0x14a   : > { %v894_v44 = vadd.f32 %v877_v8, %v749_v30 }
 0x14b   : > { %v2754_v42 = vpop.f32.mrf.mxu1  ;;  %v743_v43 = vpop.f32.mrf.mxu0 }
 0x14c   : > { %v744_v48 = vadd.f32 %v743_v43, %v670_v9  ;;  %v753_v50 = vpop.f32.mrf.mxu2 }
 0x14e   : > { %2157 = vmatmul.msk.bf16.gmra.mxu0 %vm270_vm0, %v1573_v26  ;;  %v892_v51 = vadd.f32 %v872_v6, %v744_v48 }
 0x151   : > { %v2762_v55 = vpop.f32.mrf.mxu3 }
 0x153   : > { %v680_v57 = vpop.f32.mrf.mxu1  ;;  %v745_v58 = vpop.f32.mrf.mxu0 }
 0x154   : > { %v754_v59 = vadd.f32 %v753_v50, %v680_v57  ;;  %v746_v38 = vadd.f32 %v745_v58, %v672_v25  ;;  %v2765_v0 = vpop.f32.mrf.mxu2 }
 0x156   : > { %2180 = vmatmul.msk.bf16.gmra.mxu1 %vm270_vm0, %v1706_v45  ;;  %v893_v58 = vadd.f32 %v2744_v23, %v746_v38  ;;  %v751_v23 = vadd.f32 %v2746_v33, %v2754_v42 }
 0x159   : > { %v882_v5 = vpop.f32.mrf.mxu3 }
 0x15a   : > { %v896_v7 = vadd.f32 %v882_v5, %v754_v59 }
 0x15b   : > { %v2769_v6 = vpop.f32.mrf.mxu1  ;;  %v966_v9 = vpop.f32.mrf.mxu0 }
 0x15c   : > { %v986_v10 = vadd.f32 %v966_v9, %v892_v51  ;;  %v758_v52 = vpop.f32.mrf.mxu2 }
 0x161   : > { %v2775_v27 = vpop.f32.mrf.mxu3 }
 0x163   : > { %v685_v14 = vpop.f32.mrf.mxu1  ;;  %v968_v31 = vpop.f32.mrf.mxu0 }
 0x164   : > { %v759_v15 = vadd.f32 %v758_v52, %v685_v14  ;;  %v2788_v8 = vpop.f32.mrf.mxu2  ;;  %v987_v59 = vadd.f32 %v968_v31, %v893_v58  ;;  %v895_v31 = vadd.f32 %v2762_v55, %v751_v23 }
 0x166   : > { %2181 = vmatmul.msk.bf16.gmra.mxu1 %vm270_vm0, %v1707_v18 }
 0x169   : > { %v887_v19 = vpop.f32.mrf.mxu3 }
 0x16a   : > { %v898_v61 = vadd.f32 %v887_v19, %v759_v15 }
 0x16b   : > { %v2781_v20 = vpop.f32.mrf.mxu1  ;;  %v971_v21 = vpop.f32.mrf.mxu0 }
 0x16c   : > { %v988_v22 = vadd.f32 %v971_v21, %v894_v44  ;;  %v1306_v48 = vpop.f32.mrf.mxu2 }
 0x171   : > { %v2792_v44 = vpop.f32.mrf.mxu3 }
 0x173   : > { %v973_v24 = vpop.f32.mrf.mxu0  ;;  %v1172_v25 = vpop.f32.mrf.mxu1 }
 0x174   : > { %v1192_v28 = vadd.f32 %v1172_v25, %v986_v10  ;;  %v1308_v39 = vpop.f32.mrf.mxu2  ;;  %v989_v62 = vadd.f32 %v973_v24, %v895_v31  ;;  %v756_v24 = vadd.f32 %v2765_v0, %v2769_v6 }
 0x176   : > { %v1326_v60 = vadd.f32 %v1306_v48, %v1192_v28 }
 0x179   : > { %v1401_v26 = vpop.f32.mrf.mxu3 }
 0x17a   : > { %v1421_v3 = vadd.f32 %v1401_v26, %v1326_v60 }
 0x17b   : > { %v976_v29 = vpop.f32.mrf.mxu0  ;;  %v1174_v30 = vpop.f32.mrf.mxu1 }
 0x17c   : > { %v990_v32 = vadd.f32 %v976_v29, %v896_v7  ;;  %v1193_v45 = vadd.f32 %v1174_v30, %v987_v59  ;;  %v1311_v63 = vpop.f32.mrf.mxu2 }
 0x17e   : > { %v1327_v5 = vadd.f32 %v1308_v39, %v1193_v45 }
 0x181   : > { %v1403_v54 = vpop.f32.mrf.mxu3 }
 0x182   : > { %v1422_v9 = vadd.f32 %v1403_v54, %v1327_v5  ;;  %v761_v5 = vadd.f32 %v2788_v8, %v2781_v20 }
 0x183   : > { %v2783_v34 = vpop.f32.mrf.mxu0  ;;  %v1177_v35 = vpop.f32.mrf.mxu1 }
 0x184   : > { %v1194_v36 = vadd.f32 %v1177_v35, %v988_v22  ;;  %v1313_v38 = vpop.f32.mrf.mxu2 }
 0x186   : > { %v1328_v22 = vadd.f32 %v1311_v63, %v1194_v36 }
 0x189   : > { %v1406_v1 = vpop.f32.mrf.mxu3 }
 0x18a   : > { %v1423_v29 = vadd.f32 %v1406_v1, %v1328_v22 }
 0x18b   : > { %v981_v11 = vpop.f32.mrf.mxu0  ;;  %v1179_v53 = vpop.f32.mrf.mxu1 }
 0x18c   : > { %v992_v40 = vadd.f32 %v981_v11, %v898_v61  ;;  %v1195_v21 = vadd.f32 %v1179_v53, %v989_v62  ;;  %v1316_v33 = vpop.f32.mrf.mxu2 }
 0x18e   : > { %v1329_v42 = vadd.f32 %v1313_v38, %v1195_v21 }
 0x191   : > { %v1408_v14 = vpop.f32.mrf.mxu3 }
 0x192   : > { %v1424_v35 = vadd.f32 %v1408_v14, %v1329_v42 }
 0x193   : > { %v1182_v41 = vpop.f32.mrf.mxu1  ;;  %v2794_v46 = vpop.f32.mrf.mxu0 }
 0x194   : > { %v2790_v43 = vadd.f32 %v1182_v41, %v990_v32  ;;  %v897_v41 = vadd.f32 %v2775_v27, %v756_v24 }
 0x196   : > { %v991_v26 = vadd.f32 %v2783_v34, %v897_v41  ;;  %v1330_v58 = vadd.f32 %v1316_v33, %v2790_v43 }
 0x199   : > { %v1411_v32 = vpop.f32.mrf.mxu3 }
 0x19a   : > { %v1425_v0 = vadd.f32 %v1411_v32, %v1330_v58 }
 0x19b   : > { %v1184_v47 = vpop.f32.mrf.mxu1  ;;  %v1607_v49 = vpop.f32.mrf.mxu0 }
 0x19c   : > { %v1627_v7 = vadd.f32 %v1607_v49, %v1421_v3  ;;  %v1318_v49 = vpop.f32.mrf.mxu2 }
 0x1a1   : > { %v1413_v54 = vpop.f32.mrf.mxu3 }
 0x1a3   : > { %v1187_v50 = vpop.f32.mrf.mxu1  ;;  %v1609_v56 = vpop.f32.mrf.mxu0 }
 0x1a4   : > { %v2796_v51 = vadd.f32 %v1187_v50, %v992_v40  ;;  %v1628_v13 = vadd.f32 %v1609_v56, %v1422_v9  ;;  %v1197_v56 = vadd.f32 %v1184_v47, %v991_v26  ;;  %v899_v9 = vadd.f32 %v2792_v44, %v761_v5 }
 0x1a6   : > { %v1331_v6 = vadd.f32 %v1318_v49, %v1197_v56 }
 0x1a8   : > { %v1426_v27 = vadd.f32 %v1413_v54, %v1331_v6 }
 0x1a9   : > { %v1416_v34 = vpop.f32.mrf.mxu3 }
 0x1ab   : > { %v2798_v57 = vpop.f32.mrf.mxu1  ;;  %v1612_v4 = vpop.f32.mrf.mxu0 }
 0x1ac   : > { %v1629_v30 = vadd.f32 %v1612_v4, %v1423_v29 }
 0x1b1   : > { %v1418_v8 = vpop.f32.mrf.mxu3 }
 0x1b3   : > { %v1741_v2 = vpop.f32.mrf.mxu1  ;;  %v1614_v18 = vpop.f32.mrf.mxu0 }
 0x1b4   : > { %v1761_v10 = vadd.f32 %v1741_v2, %v1627_v7  ;;  %v1630_v11 = vadd.f32 %v1614_v18, %v1424_v35  ;;  %v1321_v2 = vpop.f32.mrf.mxu2 }
 0x1b6   : > { %v1771_v17 = vadd.f32 %v2804_v12, %v1761_v10 }
 0x1b8   : > { %v1779_v19 = vmax.f32 %v1771_v17, 0.0  ;;  %v1332_v17 = vadd.f32 %v1321_v2, %v2796_v51 }
 0x1ba   : > { %v1427_v31 = vadd.f32 %v1416_v34, %v1332_v17 }
 0x1bb   : > { %v1743_v16 = vpop.f32.mrf.mxu1  ;;  %v1617_v55 = vpop.f32.mrf.mxu0 }
 0x1bc   : > { %v1762_v52 = vadd.f32 %v1743_v16, %v1628_v13  ;;  %v1631_v63 = vadd.f32 %v1617_v55, %v1425_v0  ;;  %v993_v13 = vadd.f32 %v2794_v46, %v899_v9  ;;  %v1323_v20 = vpop.f32.mrf.mxu2 }
 0x1be   : > { %v1772_v15 = vadd.f32 %v2804_v12, %v1762_v52  ;;  %v1199_v38 = vadd.f32 %v2798_v57, %v993_v13 }
 0x1c0   : > { %v1780_v61 = vmax.f32 %v1772_v15, 0.0  ;;  %v1333_v15 = vadd.f32 %v1323_v20, %v1199_v38 }
 0x1c2   : > { %v1787_v25 = vpack.c.bf16 %v1780_v61, %v1779_v19  ;;  %v1428_v62 = vadd.f32 %v1418_v8, %v1333_v15 }
 0x1c3   : > { %v1746_v28 = vpop.f32.mrf.mxu1  ;;  %v1619_v45 = vpop.f32.mrf.mxu0 }
 0x1c4   : > { %2190 = vmatmul.msk.bf16.vlgmr.msra.gmra.mxu2 %vm270_vm0, %v1787_v25  ;;  %v1763_v37 = vadd.f32 %v1746_v28, %v1629_v30  ;;  %v1632_v3 = vadd.f32 %v1619_v45, %v1426_v27 }
 0x1c6   : > { %v1773_v53 = vadd.f32 %v2804_v12, %v1763_v37 }
 0x1c8   : > { %v1781_v50 = vmax.f32 %v1773_v53, 0.0 }
 0x1cb   : > { %v1748_v40 = vpop.f32.mrf.mxu1  ;;  %v1622_v7 = vpop.f32.mrf.mxu0 }
 0x1cc   : > { %v1764_v36 = vadd.f32 %v1748_v40, %v1630_v11  ;;  %v1633_v44 = vadd.f32 %v1622_v7, %v1427_v31 }
 0x1ce   : > { %v1774_v48 = vadd.f32 %v2804_v12, %v1764_v36 }
 0x1d0   : > { %v1782_v39 = vmax.f32 %v1774_v48, 0.0 }
 0x1d2   : > { %v1788_v59 = vpack.c.bf16 %v1782_v39, %v1781_v50 }
 0x1d3   : > { %v1751_v60 = vpop.f32.mrf.mxu1  ;;  %v1624_v18 = vpop.f32.mrf.mxu0 }
 0x1d4   : > { %2191 = vmatmul.msk.bf16.gmra.mxu2 %vm270_vm0, %v1788_v59  ;;  %v1765_v1 = vadd.f32 %v1751_v60, %v1631_v63  ;;  %v1634_v46 = vadd.f32 %v1624_v18, %v1428_v62 }
 0x1d6   : > { %v1775_v47 = vadd.f32 %v2804_v12, %v1765_v1 }
 0x1d8   : > { %v1783_v16 = vmax.f32 %v1775_v47, 0.0 }
 0x1db   : > { %v1753_v4 = vpop.f32.mrf.mxu1 }
 0x1dc   : > { %v1766_v43 = vadd.f32 %v1753_v4, %v1632_v3 }
 0x1de   : > { %v1776_v10 = vadd.f32 %v2804_v12, %v1766_v43 }
 0x1e0   : > { %v1784_v23 = vmax.f32 %v1776_v10, 0.0 }
 0x1e2   : > { %v1789_v52 = vpack.c.bf16 %v1784_v23, %v1783_v16 }
 0x1e3   : > { %v1756_v14 = vpop.f32.mrf.mxu1 }
 0x1e4   : > { %2192 = vmatmul.msk.bf16.gmra.mxu2 %vm270_vm0, %v1789_v52  ;;  %v1767_v19 = vadd.f32 %v1756_v14, %v1633_v44 }
 0x1e6   : > { %v1777_v21 = vadd.f32 %v2804_v12, %v1767_v19 }
 0x1e8   : > { %v1785_v22 = vmax.f32 %v1777_v21, 0.0 }
 0x1eb   : > { %v1758_v61 = vpop.f32.mrf.mxu1 }
 0x1ec   : > { %v1768_v57 = vadd.f32 %v1758_v61, %v1634_v46 }
 0x1ee   : > { %v1778_v51 = vadd.f32 %v2804_v12, %v1768_v57 }
 0x1f0   : > { %v1786_v25 = vmax.f32 %v1778_v51, 0.0 }
 0x1f2   : > { %v1790_v28 = vpack.c.bf16 %v1786_v25, %v1785_v22 }
 0x1f4   : > { %2193 = vmatmul.msk.bf16.gmra.mxu2 %vm270_vm0, %v1790_v28 }
 0x247   : > { %v1828_v29 = vpop.f32.mrf.mxu2 }
 0x248   : > { %1849 = vst.msk [vmem:[%s217_s12] sm:$0xff] %vm1848_vm13, %v1828_v29 }
 0x24f   : > { %v1830_v33 = vpop.f32.mrf.mxu2 }
 0x250   : > { %1850 = vst.msk [vmem:[%s217_s12 + $0x8] sm:$0xff] %vm1848_vm13, %v1830_v33 }
 0x257   : > { %v1833_v42 = vpop.f32.mrf.mxu2 }
 0x258   : > { %1851 = vst.msk [vmem:[%s217_s12 + $0x10] sm:$0xff] %vm1848_vm13, %v1833_v42 }
 0x25f   : > { %v1835_v12 = vpop.f32.mrf.mxu2 }
 0x260   : > { %1852 = vst.msk [vmem:[%s217_s12 + $0x18] sm:$0xff] %vm1848_vm13, %v1835_v12 }
 0x267   : > { %v1838_v30 = vpop.f32.mrf.mxu2 }
 0x268   : > { %1853 = vst.msk [vmem:[%s217_s12 + $0x20] sm:$0xff] %vm1848_vm13, %v1838_v30 }
 0x26f   : > { %v1840_v32 = vpop.f32.mrf.mxu2 }
 0x270   : > { %1854 = vst.msk [vmem:[%s217_s12 + $0x28] sm:$0xff] %vm1848_vm13, %v1840_v32 }
 0x277   : > { %v1843_v35 = vpop.f32.mrf.mxu2 }
 0x278   : > { %1855 = vst.msk [vmem:[%s217_s12 + $0x30] sm:$0xff] %vm1848_vm13, %v1843_v35 }
 0x27f   : > { %v1845_v37 = vpop.f32.mrf.mxu2 }
 0x280   : > { %1856 = vst.msk [vmem:[%s217_s12 + $0x38] sm:$0xff] %vm1848_vm13, %v1845_v37 }
 0x281   : > { %2316 = shalt.err (!%p2313_p3)
}
 0x282   : > { %s2354_s10 = smov 128   ;;  %s2355_s11 = smov 8  }
 0x283   : > { %2245 = dma.vmem_to_hbm [thread:$0]  (%p2424_p5), %s1871_s17, 1024, %s1873_s23, %s1858_s25, %s2354_s10, %s2354_s10, %s2355_s11  }
 0x284 PF: > { %p2251_p4 = scmp.ge.s32.totalorder %s2351_s21, 2  ;;  %s1887_s12 = sand.u32 1, %s2339_s18  }
 0x285   : > { %s1888_s13 = scalar_lea.sflag [#allocation4], %s1887_s12 }
 0x286   : > { %p2248_p7 = pnand %p2251_p4, %p2428_p6 }
 0x288   : > { %p2249_p8 = pneg %p2248_p7 }
 0x28a   : > { %2334 = dma.done.wait (%p2249_p8), %s1888_s13, 1024  }
 0x28b   : > { %2336 = vsyncadd (%p2249_p8), %s1888_s13, 4294966272  ;;  %p15_p9 = scmp.ge.s32.totalorder %s2411_s24, 4   ;;  %s2888_s18 = smov %s2343_s19 }
 0x28c   : > { %s2889_s19 = smov %s2347_s20  ;;  %s2890_s20 = smov %s2422_s27 }
 0x28d   : > { %s2891_s21 = smov %s2411_s24  ;;  %17 = sbr.rel (!%p15_p9) target bundleno = 3 (0x3), region = 85 }
 0x292   :  { %1894 = vsyncpa [#allocation4], 1 }
 0x293   :  { %1896 = vsyncpa [#allocation4 + $0x1], 1 }

</bundles_post_ra>
